<compile_context>
chip_gen: v5e
topology: v5e:2x2
jax: 0.10.0
libtpu: 0.0.40
codegen_flags: <defaults>
</compile_context>

<pallas_src>
from functools import partial

import jax
import jax.numpy as jnp
from jax import lax
from jax.experimental import pallas as pl
from jax.experimental.pallas import tpu as pltpu


# ----------------------------------------------------------------------------
# Hardware-aware sizing helpers
# ----------------------------------------------------------------------------
def _tpu_generation():
    try:
        kind = jax.devices()[0].device_kind.lower()
    except Exception:
        return 6
    for g in (7, 6, 5, 4, 3):
        if f"v{g}" in kind or f"tpu{g}" in kind:
            return g
    return 6


def _tpu_vmem_capacity():
    try:
        return int(pltpu.get_tpu_info().vmem_capacity_bytes)
    except Exception:
        # v7x has 64 MiB per TensorCore; older parts 128 MiB.
        return (64 << 20) if _tpu_generation() >= 7 else (128 << 20)


def _tile_vmem_bytes(H, W, C, Cq, TH):
    """Rough per-grid-step VMEM footprint (ignores lane/sublane padding)."""
    bf16, f32 = 2, 4
    streamed = (2 * TH * W * Cq * bf16      # q tile (double-buffered)
                + 2 * W * Cq * H * bf16     # K column layout (held per batch)
                + 2 * TH * Cq * W * bf16    # K row tile
                + 2 * W * H * C * bf16      # V column layout (held per batch)
                + 2 * TH * W * C * bf16     # V row tile
                + 2 * TH * W * C * f32      # residual x tile
                + 2 * TH * W * C * f32)     # output tile
    interm = (TH * W * (H + W) * (f32 + bf16)   # energies (f32) + probs (bf16)
              + 4 * TH * W * C * f32            # out_h_w / out_h / out_w / fused
              + 2 * TH * W * Cq * bf16)         # q layouts
    return streamed + interm


def _pick_block_h(H, W, C, Cq, vmem_cap, block_h=None):
    if block_h is not None:
        if H % block_h:
            raise ValueError(f"block_h={block_h} must divide H={H}")
        return block_h
    budget = int(vmem_cap * 0.70)           # headroom for padding + Mosaic internals
    divisors = [d for d in range(H, 0, -1) if H % d == 0]
    # Prefer bf16-sublane-packed (x16), then f32-sublane (x8), then anything.
    for pref in (16, 8, 1):
        for d in divisors:
            if d % pref == 0 and _tile_vmem_bytes(H, W, C, Cq, d) <= budget:
                return d
    raise ValueError(
        "CrissCrossAttention tile does not fit VMEM even at block_h=1 "
        f"(H={H}, W={W}, C={C}, vmem_cap={vmem_cap})")


def _vmem_limit_bytes(need, cap):
    return int(min(max(need + (8 << 20), 32 << 20), int(cap * 0.9)))


# ----------------------------------------------------------------------------
# Kernel
# ----------------------------------------------------------------------------
def cca_kernel(q_ref, kcol_ref, krow_ref, vcol_ref, vrow_ref, x_ref, g_ref,
               o_ref, *, exp_bf16):
    # Blocks:
    #   q_ref    (1, TH, W, Cq) bf16   row tile of Q
    #   kcol_ref (1, W, Cq, H)  bf16   K, column layout, full per batch
    #   krow_ref (1, TH, Cq, W) bf16   K, row layout, row tile
    #   vcol_ref (1, W, H, C)   bf16   V, column layout, full per batch
    #   vrow_ref (1, TH, W, C)  bf16   V, row layout, row tile
    #   x_ref    (1, TH, W, C)  f32    residual
    #   g_ref    (1, 1)         f32    gamma (SMEM)
    #   o_ref    (1, TH, W, C)  f32
    TH, W = q_ref.shape[1], q_ref.shape[2]
    H = kcol_ref.shape[3]
    t = pl.program_id(1)
    bf16 = jnp.bfloat16

    q_hw = q_ref[0]                                        # (TH, W, Cq) bf16
    q_wh = jnp.transpose(q_hw, (1, 0, 2))                  # (W, TH, Cq) bf16

    # ---- column (H-axis) energies, kept in (W, TH, H) layout end-to-end;
    #      Cq sits in the middle of K so this is a plain (M,K)x(K,N) per batch.
    e_h = lax.dot_general(q_wh, kcol_ref[0],
                          (((2,), (1,)), ((0,), (0,))),
                          preferred_element_type=jnp.float32)      # (W, TH, H)
    # diagonal -inf mask (the INF() term), broadcast over W.
    row_i = lax.broadcasted_iota(jnp.int32, (1, TH, H), 1) + t * TH
    col_i = lax.broadcasted_iota(jnp.int32, (1, TH, H), 2)
    e_h = jnp.where(row_i == col_i, -jnp.inf, e_h)

    # ---- row (W-axis) energies.
    e_w = lax.dot_general(q_hw, krow_ref[0],
                          (((2,), (1,)), ((0,), (0,))),
                          preferred_element_type=jnp.float32)      # (TH, W, W)

    # ---- joint softmax over the H + W logits: no concatenation, no slicing;
    #      normalization deferred to a single reciprocal at the end.
    m_h = jnp.max(e_h, axis=2, keepdims=True)                      # (W, TH, 1)
    m_w = jnp.max(e_w, axis=2, keepdims=True)                      # (TH, W, 1)
    m_hw = jnp.maximum(jnp.transpose(m_h, (1, 0, 2)), m_w)         # (TH, W, 1)
    m_wh = jnp.transpose(m_hw, (1, 0, 2))                          # (W, TH, 1)

    if exp_bf16:
        # v6e/v7x: bf16 exp roughly doubles EUP throughput and the bf16
        # probabilities feed the aggregation MXU matmuls directly.
        p_h = jnp.exp((e_h - m_wh).astype(bf16))                   # (W, TH, H)
        p_w = jnp.exp((e_w - m_hw).astype(bf16))                   # (TH, W, W)
        s_h = jnp.sum(p_h, axis=2, keepdims=True, dtype=jnp.float32)
        s_w = jnp.sum(p_w, axis=2, keepdims=True, dtype=jnp.float32)
    else:
        # v5e and older: no bf16 EUP/VPU — keep exp in f32.
        p_h32 = jnp.exp(e_h - m_wh)
        p_w32 = jnp.exp(e_w - m_hw)
        s_h = jnp.sum(p_h32, axis=2, keepdims=True)
        s_w = jnp.sum(p_w32, axis=2, keepdims=True)
        p_h = p_h32.astype(bf16)
        p_w = p_w32.astype(bf16)
    denom = jnp.transpose(s_h, (1, 0, 2)) + s_w                    # (TH, W, 1)

    # ---- aggregate values with un-normalized weights.
    out_h_w = lax.dot_general(p_h, vcol_ref[0],
                              (((2,), (1,)), ((0,), (0,))),
                              preferred_element_type=jnp.float32)  # (W, TH, C)
    out_h = jnp.transpose(out_h_w, (1, 0, 2))                      # (TH, W, C)
    out_w = lax.dot_general(p_w, vrow_ref[0],
                            (((2,), (1,)), ((0,), (0,))),
                            preferred_element_type=jnp.float32)    # (TH, W, C)

    # ---- one deferred normalization (EUP reciprocal) + f32 residual.
    inv = pl.reciprocal(denom, approx=True)                        # (TH, W, 1)
    gamma = g_ref[0, 0]
    o_ref[0] = (gamma * ((out_h + out_w) * inv) + x_ref[0]).astype(o_ref.dtype)


# ----------------------------------------------------------------------------
# Wrapper
# ----------------------------------------------------------------------------
def criss_cross_attention(x_nchw, wq, bq, wk, bk, wv, bv, gamma, block_h=None):
    """x_nchw: (B, C, H, W) float32.  wq/wk: (C//8, C), wv: (C, C), biases 1-D."""
    B, C, H, W = x_nchw.shape
    Cq = wq.shape[0]
    bf16 = jnp.bfloat16

    vmem_cap = _tpu_vmem_capacity()
    gen = _tpu_generation()
    TH = _pick_block_h(H, W, C, Cq, vmem_cap, block_h)
    exp_bf16 = gen >= 6
    need = _tile_vmem_bytes(H, W, C, Cq, TH)

    # ---- pre-pass (plain XLA): channels-last; 1x1-conv projections as bf16
    #      GEMMs with f32 accumulation; bf16 cast BEFORE the layout transposes.
    x_nhwc = jnp.transpose(x_nchw, (0, 2, 3, 1)).astype(jnp.float32)  # (B,H,W,C)
    xb = x_nhwc.astype(bf16)
    wq_b = jnp.transpose(wq).astype(bf16)                             # (C, Cq)
    wk_b = jnp.transpose(wk).astype(bf16)                             # (C, Cq)
    wv_b = jnp.transpose(wv).astype(bf16)                             # (C, C)

    q = jnp.einsum('bhwc,cd->bhwd', xb, wq_b,
                   preferred_element_type=jnp.float32) + bq.astype(jnp.float32)
    k = jnp.einsum('bhwc,cd->bhwd', xb, wk_b,
                   preferred_element_type=jnp.float32) + bk.astype(jnp.float32)
    v = jnp.einsum('bhwc,cd->bhwd', xb, wv_b,
                   preferred_element_type=jnp.float32) + bv.astype(jnp.float32)

    q_hw = q.astype(bf16)                                   # (B, H, W, Cq)
    kb = k.astype(bf16)
    vb = v.astype(bf16)
    k_col = jnp.transpose(kb, (0, 2, 3, 1))                 # (B, W, Cq, H)
    k_row = jnp.transpose(kb, (0, 1, 3, 2))                 # (B, H, Cq, W)
    v_col = jnp.transpose(vb, (0, 2, 1, 3))                 # (B, W, H, C)
    v_row = vb                                              # (B, H, W, C)
    g = jnp.asarray(gamma, jnp.float32).reshape(1, 1)

    kernel = partial(cca_kernel, exp_bf16=exp_bf16)

    out_nhwc = pl.pallas_call(
        kernel,
        out_shape=jax.ShapeDtypeStruct((B, H, W, C), jnp.float32),
        grid_spec=pltpu.PrefetchScalarGridSpec(
            num_scalar_prefetch=0,
            grid=(B, H // TH),
            in_specs=[
                pl.BlockSpec((1, TH, W, Cq), lambda b, t: (b, t, 0, 0)),   # Q tile
                pl.BlockSpec((1, W, Cq, H), lambda b, t: (b, 0, 0, 0)),    # K cols
                pl.BlockSpec((1, TH, Cq, W), lambda b, t: (b, t, 0, 0)),   # K rows
                pl.BlockSpec((1, W, H, C), lambda b, t: (b, 0, 0, 0)),     # V cols
                pl.BlockSpec((1, TH, W, C), lambda b, t: (b, t, 0, 0)),    # V rows
                pl.BlockSpec((1, TH, W, C), lambda b, t: (b, t, 0, 0)),    # x resid
                pl.BlockSpec(memory_space=pltpu.MemorySpace.SMEM),         # gamma
            ],
            out_specs=pl.BlockSpec((1, TH, W, C), lambda b, t: (b, t, 0, 0)),
        ),
        compiler_params=pltpu.CompilerParams(
            dimension_semantics=("parallel", "parallel"),
            vmem_limit_bytes=_vmem_limit_bytes(need, vmem_cap),
        ),
    )(q_hw, k_col, k_row, v_col, v_row, x_nhwc, g)

    return jnp.transpose(out_nhwc, (0, 3, 1, 2))


# ----------------------------------------------------------------------------
# Pure-JAX f32 reference mirroring the PyTorch forward (NCHW)
# ----------------------------------------------------------------------------
def criss_cross_attention_ref(x, wq, bq, wk, bk, wv, bv, gamma):
    B, C, H, W = x.shape
    hp = jax.lax.Precision.HIGHEST

    def conv1x1(x, w, b):
        return jnp.einsum('bchw,oc->bohw', x, w, precision=hp) + b[None, :, None, None]

    q = conv1x1(x, wq, bq)
    k = conv1x1(x, wk, bk)
    v = conv1x1(x, wv, bv)
    e_h = jnp.einsum('bchw,bckw->bhwk', q, k, precision=hp)
    eye = jnp.eye(H, dtype=bool)[None, :, None, :]
    e_h = jnp.where(eye, -jnp.inf, e_h)
    e_w = jnp.einsum('bchw,bchk->bhwk', q, k, precision=hp)
    att = jax.nn.softmax(jnp.concatenate([e_h, e_w], axis=-1), axis=-1)
    att_h = att[..., :H]
    att_w = att[..., H:]
    out_h = jnp.einsum('bckw,bhwk->bchw', v, att_h, precision=hp)
    out_w = jnp.einsum('bchk,bhwk->bchw', v, att_w, precision=hp)
    return gamma * (out_h + out_w) + x


if __name__ == "__main__":
    B, C, H, W = 2, 16, 16, 16   # in_dim = 16 -> query/key channels = 2
    Cq = C // 8

    key = jax.random.PRNGKey(0)
    kx, kq, kk, kv, kbq, kbk, kbv = jax.random.split(key, 7)
    x = jax.random.normal(kx, (B, C, H, W), dtype=jnp.float32)
    wq = jax.random.normal(kq, (Cq, C), dtype=jnp.float32) * 0.1
    wk = jax.random.normal(kk, (Cq, C), dtype=jnp.float32) * 0.1
    wv = jax.random.normal(kv, (C, C), dtype=jnp.float32) * 0.1
    bq = jax.random.normal(kbq, (Cq,), dtype=jnp.float32) * 0.1
    bk = jax.random.normal(kbk, (Cq,), dtype=jnp.float32) * 0.1
    bv = jax.random.normal(kbv, (C,), dtype=jnp.float32) * 0.1
    # PyTorch initializes gamma to 0 (output == x); use a nonzero deterministic
    # value so the attention path actually contributes to the result.
    gamma = jnp.float32(0.5)

    # block_h=8 exercises the row-tiled grid (2 row steps per batch element).
    out = criss_cross_attention(x, wq, bq, wk, bk, wv, bv, gamma, block_h=8)
    out = jax.block_until_ready(out)

    ref = criss_cross_attention_ref(x, wq, bq, wk, bk, wv, bv, gamma)
    assert out.shape == (B, C, H, W)
    # bf16 matmul operands / bf16 exp (f32 accumulation) + approx reciprocal
    # -> ~1e-3 level error vs the f32 HIGHEST-precision reference.
    assert jnp.allclose(out, ref, atol=1e-2, rtol=1e-2), (
        float(jnp.max(jnp.abs(out - ref))))

    print("KERNEL_OK")
</pallas_src>

<mosaic_0001>
module attributes {stable_mosaic.version = 11 : i64} {
  func.func @cca_kernel(%arg0: i32, %arg1: i32, %arg2: memref<1x8x16x2xbf16, #tpu.memory_space<vmem>>, %arg3: memref<1x16x2x16xbf16, #tpu.memory_space<vmem>>, %arg4: memref<1x8x2x16xbf16, #tpu.memory_space<vmem>>, %arg5: memref<1x16x16x16xbf16, #tpu.memory_space<vmem>>, %arg6: memref<1x8x16x16xbf16, #tpu.memory_space<vmem>>, %arg7: memref<1x8x16x16xf32, #tpu.memory_space<vmem>>, %arg8: memref<1x1xf32, #tpu.memory_space<smem>>, %arg9: memref<1x8x16x16xf32, #tpu.memory_space<vmem>>) attributes {dimension_semantics = [#tpu.dimension_semantics<parallel>, #tpu.dimension_semantics<parallel>], iteration_bounds = array<i64: 2, 2>, scalar_prefetch = 0 : i64, scratch_operands = 0 : i64, tpu.core_type = #tpu.core_type<tc>, window_params = [{transform_indices = @transform_0, window_bounds = array<i64: 1, 8, 16, 2>}, {transform_indices = @transform_1, window_bounds = array<i64: 1, 16, 2, 16>}, {transform_indices = @transform_2, window_bounds = array<i64: 1, 8, 2, 16>}, {transform_indices = @transform_3, window_bounds = array<i64: 1, 16, 16, 16>}, {transform_indices = @transform_4, window_bounds = array<i64: 1, 8, 16, 16>}, {transform_indices = @transform_5, window_bounds = array<i64: 1, 8, 16, 16>}, {transform_indices = @transform_6, window_bounds = array<i64: 1, 1>}, {transform_indices = @transform_7, window_bounds = array<i64: 1, 8, 16, 16>}]} {
    %c0 = arith.constant 0 : index
    %c0_0 = arith.constant 0 : index
    %c0_1 = arith.constant 0 : index
    %c0_2 = arith.constant 0 : index
    %0 = vector.load %arg2[%c0, %c0_0, %c0_1, %c0_2] : memref<1x8x16x2xbf16, #tpu.memory_space<vmem>>, vector<1x8x16x2xbf16>
    %1 = vector.shape_cast %0 : vector<1x8x16x2xbf16> to vector<8x16x2xbf16>
    %2 = tpu.transpose %1, [1, 0, 2] : vector<8x16x2xbf16> -> vector<16x8x2xbf16>
    %c0_3 = arith.constant 0 : index
    %c0_4 = arith.constant 0 : index
    %c0_5 = arith.constant 0 : index
    %c0_6 = arith.constant 0 : index
    %3 = vector.load %arg3[%c0_3, %c0_4, %c0_5, %c0_6] : memref<1x16x2x16xbf16, #tpu.memory_space<vmem>>, vector<1x16x2x16xbf16>
    %4 = vector.shape_cast %3 : vector<1x16x2x16xbf16> to vector<16x2x16xbf16>
    %cst = arith.constant dense<0.000000e+00> : vector<16x8x16xf32>
    %5 = tpu.matmul %2, %4, %cst {dimension_numbers = #tpu.dot_dimension_numbers<[2], [1], [1], [2], [0, 0, 0, 1, 1, 2], [0], [0]>} : vector<16x8x2xbf16>, vector<16x2x16xbf16>, vector<16x8x16xf32> -> vector<16x8x16xf32>
    %6 = tpu.iota {dimensions = array<i32: 1>} : vector<1x8x16xi32>
    %c8_i32 = arith.constant 8 : i32
    %7 = arith.muli %arg1, %c8_i32 : i32
    %8 = vector.broadcast %7 : i32 to vector<1x8x16xi32>
    %9 = arith.addi %6, %8 : vector<1x8x16xi32>
    %10 = tpu.iota {dimensions = array<i32: 2>} : vector<1x8x16xi32>
    %11 = arith.cmpi eq, %9, %10 : vector<1x8x16xi32>
    %cst_7 = arith.constant 0xFF800000 : f32
    %12 = vector.shape_cast %11 : vector<1x8x16xi1> to vector<1x8x16xi1>
    %13 = vector.broadcast %12 : vector<1x8x16xi1> to vector<16x8x16xi1>
    %14 = vector.broadcast %cst_7 : f32 to vector<16x8x16xf32>
    %15 = arith.select %13, %14, %5 : vector<16x8x16xi1>, vector<16x8x16xf32>
    %c0_8 = arith.constant 0 : index
    %c0_9 = arith.constant 0 : index
    %c0_10 = arith.constant 0 : index
    %c0_11 = arith.constant 0 : index
    %16 = vector.load %arg4[%c0_8, %c0_9, %c0_10, %c0_11] : memref<1x8x2x16xbf16, #tpu.memory_space<vmem>>, vector<1x8x2x16xbf16>
    %17 = vector.shape_cast %16 : vector<1x8x2x16xbf16> to vector<8x2x16xbf16>
    %cst_12 = arith.constant dense<0.000000e+00> : vector<8x16x16xf32>
    %18 = tpu.matmul %1, %17, %cst_12 {dimension_numbers = #tpu.dot_dimension_numbers<[2], [1], [1], [2], [0, 0, 0, 1, 1, 2], [0], [0]>} : vector<8x16x2xbf16>, vector<8x2x16xbf16>, vector<8x16x16xf32> -> vector<8x16x16xf32>
    %cst_13 = arith.constant dense<0xFF800000> : vector<16x8xf32>
    %19 = vector.multi_reduction <maximumf>, %15, %cst_13 [2] : vector<16x8x16xf32> to vector<16x8xf32>
    %20 = vector.shape_cast %19 : vector<16x8xf32> to vector<16x8x1xf32>
    %cst_14 = arith.constant dense<0xFF800000> : vector<8x16xf32>
    %21 = vector.multi_reduction <maximumf>, %18, %cst_14 [2] : vector<8x16x16xf32> to vector<8x16xf32>
    %22 = vector.shape_cast %21 : vector<8x16xf32> to vector<8x16x1xf32>
    %23 = tpu.transpose %20, [1, 0, 2] : vector<16x8x1xf32> -> vector<8x16x1xf32>
    %24 = arith.maximumf %23, %22 : vector<8x16x1xf32>
    %25 = tpu.transpose %24, [1, 0, 2] : vector<8x16x1xf32> -> vector<16x8x1xf32>
    %26 = vector.broadcast %25 : vector<16x8x1xf32> to vector<16x8x16xf32>
    %27 = arith.subf %15, %26 : vector<16x8x16xf32>
    %28 = arith.truncf %27 : vector<16x8x16xf32> to vector<16x8x16xbf16>
    %29 = math.exp %28 : vector<16x8x16xbf16>
    %30 = vector.broadcast %24 : vector<8x16x1xf32> to vector<8x16x16xf32>
    %31 = arith.subf %18, %30 : vector<8x16x16xf32>
    %32 = arith.truncf %31 : vector<8x16x16xf32> to vector<8x16x16xbf16>
    %33 = math.exp %32 : vector<8x16x16xbf16>
    %34 = arith.extf %29 : vector<16x8x16xbf16> to vector<16x8x16xf32>
    %cst_15 = arith.constant dense<0.000000e+00> : vector<16x8xf32>
    %35 = vector.multi_reduction <add>, %34, %cst_15 [2] : vector<16x8x16xf32> to vector<16x8xf32>
    %36 = vector.shape_cast %35 : vector<16x8xf32> to vector<16x8x1xf32>
    %37 = arith.extf %33 : vector<8x16x16xbf16> to vector<8x16x16xf32>
    %cst_16 = arith.constant dense<0.000000e+00> : vector<8x16xf32>
    %38 = vector.multi_reduction <add>, %37, %cst_16 [2] : vector<8x16x16xf32> to vector<8x16xf32>
    %39 = vector.shape_cast %38 : vector<8x16xf32> to vector<8x16x1xf32>
    %40 = tpu.transpose %36, [1, 0, 2] : vector<16x8x1xf32> -> vector<8x16x1xf32>
    %41 = arith.addf %40, %39 : vector<8x16x1xf32>
    %c0_17 = arith.constant 0 : index
    %c0_18 = arith.constant 0 : index
    %c0_19 = arith.constant 0 : index
    %c0_20 = arith.constant 0 : index
    %42 = vector.load %arg5[%c0_17, %c0_18, %c0_19, %c0_20] : memref<1x16x16x16xbf16, #tpu.memory_space<vmem>>, vector<1x16x16x16xbf16>
    %43 = vector.shape_cast %42 : vector<1x16x16x16xbf16> to vector<16x16x16xbf16>
    %cst_21 = arith.constant dense<0.000000e+00> : vector<16x8x16xf32>
    %44 = tpu.matmul %29, %43, %cst_21 {dimension_numbers = #tpu.dot_dimension_numbers<[2], [1], [1], [2], [0, 0, 0, 1, 1, 2], [0], [0]>} : vector<16x8x16xbf16>, vector<16x16x16xbf16>, vector<16x8x16xf32> -> vector<16x8x16xf32>
    %45 = tpu.transpose %44, [1, 0, 2] : vector<16x8x16xf32> -> vector<8x16x16xf32>
    %c0_22 = arith.constant 0 : index
    %c0_23 = arith.constant 0 : index
    %c0_24 = arith.constant 0 : index
    %c0_25 = arith.constant 0 : index
    %46 = vector.load %arg6[%c0_22, %c0_23, %c0_24, %c0_25] : memref<1x8x16x16xbf16, #tpu.memory_space<vmem>>, vector<1x8x16x16xbf16>
    %47 = vector.shape_cast %46 : vector<1x8x16x16xbf16> to vector<8x16x16xbf16>
    %cst_26 = arith.constant dense<0.000000e+00> : vector<8x16x16xf32>
    %48 = tpu.matmul %33, %47, %cst_26 {dimension_numbers = #tpu.dot_dimension_numbers<[2], [1], [1], [2], [0, 0, 0, 1, 1, 2], [0], [0]>} : vector<8x16x16xbf16>, vector<8x16x16xbf16>, vector<8x16x16xf32> -> vector<8x16x16xf32>
    %49 = tpu.reciprocal %41 {approx = true} : vector<8x16x1xf32> -> vector<8x16x1xf32>
    %c0_27 = arith.constant 0 : index
    %c0_28 = arith.constant 0 : index
    %50 = memref.load %arg8[%c0_27, %c0_28] : memref<1x1xf32, #tpu.memory_space<smem>>
    %51 = arith.addf %45, %48 : vector<8x16x16xf32>
    %52 = vector.broadcast %49 : vector<8x16x1xf32> to vector<8x16x16xf32>
    %53 = arith.mulf %51, %52 : vector<8x16x16xf32>
    %54 = vector.broadcast %50 : f32 to vector<8x16x16xf32>
    %55 = arith.mulf %54, %53 : vector<8x16x16xf32>
    %c0_29 = arith.constant 0 : index
    %c0_30 = arith.constant 0 : index
    %c0_31 = arith.constant 0 : index
    %c0_32 = arith.constant 0 : index
    %56 = vector.load %arg7[%c0_29, %c0_30, %c0_31, %c0_32] : memref<1x8x16x16xf32, #tpu.memory_space<vmem>>, vector<1x8x16x16xf32>
    %57 = vector.shape_cast %56 : vector<1x8x16x16xf32> to vector<8x16x16xf32>
    %58 = arith.addf %55, %57 : vector<8x16x16xf32>
    %c0_33 = arith.constant 0 : index
    %c0_34 = arith.constant 0 : index
    %c0_35 = arith.constant 0 : index
    %c0_36 = arith.constant 0 : index
    %59 = vector.load %arg9[%c0_33, %c0_34, %c0_35, %c0_36] : memref<1x8x16x16xf32, #tpu.memory_space<vmem>>, vector<1x8x16x16xf32>
    %60 = vector.shape_cast %59 : vector<1x8x16x16xf32> to vector<8x16x16xf32>
    %61 = vector.shape_cast %58 : vector<8x16x16xf32> to vector<1x8x16x16xf32>
    tpu.vector_store %arg9[%c0_33, %c0_34, %c0_35, %c0_36], %61 {strides = array<i32>} : memref<1x8x16x16xf32, #tpu.memory_space<vmem>>, vector<1x8x16x16xf32>,
    return
  }
  func.func @transform_0(%arg0: i32, %arg1: i32) -> (i32, i32, i32, i32) {
    %c0_i32 = arith.constant 0 : i32
    %c0_i32_0 = arith.constant 0 : i32
    %c0_i32_1 = arith.constant 0 : i32
    return %arg0, %arg1, %c0_i32, %c0_i32_0 : i32, i32, i32, i32
  }
  func.func @transform_1(%arg0: i32, %arg1: i32) -> (i32, i32, i32, i32) {
    %c0_i32 = arith.constant 0 : i32
    %c0_i32_0 = arith.constant 0 : i32
    %c0_i32_1 = arith.constant 0 : i32
    %c0_i32_2 = arith.constant 0 : i32
    return %arg0, %c0_i32, %c0_i32_0, %c0_i32_1 : i32, i32, i32, i32
  }
  func.func @transform_2(%arg0: i32, %arg1: i32) -> (i32, i32, i32, i32) {
    %c0_i32 = arith.constant 0 : i32
    %c0_i32_0 = arith.constant 0 : i32
    %c0_i32_1 = arith.constant 0 : i32
    return %arg0, %arg1, %c0_i32, %c0_i32_0 : i32, i32, i32, i32
  }
  func.func @transform_3(%arg0: i32, %arg1: i32) -> (i32, i32, i32, i32) {
    %c0_i32 = arith.constant 0 : i32
    %c0_i32_0 = arith.constant 0 : i32
    %c0_i32_1 = arith.constant 0 : i32
    %c0_i32_2 = arith.constant 0 : i32
    return %arg0, %c0_i32, %c0_i32_0, %c0_i32_1 : i32, i32, i32, i32
  }
  func.func @transform_4(%arg0: i32, %arg1: i32) -> (i32, i32, i32, i32) {
    %c0_i32 = arith.constant 0 : i32
    %c0_i32_0 = arith.constant 0 : i32
    %c0_i32_1 = arith.constant 0 : i32
    return %arg0, %arg1, %c0_i32, %c0_i32_0 : i32, i32, i32, i32
  }
  func.func @transform_5(%arg0: i32, %arg1: i32) -> (i32, i32, i32, i32) {
    %c0_i32 = arith.constant 0 : i32
    %c0_i32_0 = arith.constant 0 : i32
    %c0_i32_1 = arith.constant 0 : i32
    return %arg0, %arg1, %c0_i32, %c0_i32_0 : i32, i32, i32, i32
  }
  func.func @transform_6(%arg0: i32, %arg1: i32) -> (i32, i32) {
    %c0_i32 = arith.constant 0 : i32
    %c0_i32_0 = arith.constant 0 : i32
    %c0_i32_1 = arith.constant 0 : i32
    return %c0_i32, %c0_i32_0 : i32, i32
  }
  func.func @transform_7(%arg0: i32, %arg1: i32) -> (i32, i32, i32, i32) {
    %c0_i32 = arith.constant 0 : i32
    %c0_i32_0 = arith.constant 0 : i32
    %c0_i32_1 = arith.constant 0 : i32
    return %arg0, %arg1, %c0_i32, %c0_i32_0 : i32, i32, i32, i32
  }
}

</mosaic_0001>

<bundles_post_ra>
// kernel: tpu_custom_call.1
= control target key start
LH: loop header
LB: loop body
LE: loop exit
PB: predicated region body
PF: predicated region fallthrough
CT: control target
= control target key end

     0   :  { %s5876_s0 = inlined_call_operand.vmem [shape: bf16[2,16,16,2], index: 0, kind: input, shape index: {}]   ;;  %s5877_s1 = inlined_call_operand.vmem [shape: bf16[2,16,2,16], index: 1, kind: input, shape index: {}]   ;;  %s5878_s2 = inlined_call_operand.hbm [shape: bf16[2,16,2,16], index: 2, kind: input, shape index: {}]   ;;  %s5879_s3 = inlined_call_operand.vmem [shape: bf16[2,16,16,16], index: 3, kind: input, shape index: {}]   ;;  %s5880_s4 = inlined_call_operand.hbm [shape: bf16[2,16,16,16], index: 4, kind: input, shape index: {}]   ;;  %s5881_s5 = inlined_call_operand.hbm [shape: f32[2,16,16,16], index: 5, kind: input, shape index: {}]   ;;  %s5882_s6 = inlined_call_operand.<no memory space> [shape: f32[1,1], index: 6, kind: input, shape index: {}]   ;;  %s5883_s7 = inlined_call_operand.hbm [shape: f32[2,16,16,16], index: 7, kind: output, shape index: {}]  }
   0x1   :  { %5909 = sst [smem:[#allocation37_spill]] %s5879_s3 }
   0x2   :  { %5910 = sst [smem:[#allocation38_spill]] %s5880_s4 }
   0x3   :  { %5911 = sst [smem:[#allocation39_spill]] %s5881_s5 }
   0x4   :  { %5912 = sst [smem:[#allocation40_spill]] %s5883_s7 }
   0x5   :  { %12 = sst [smem:[#allocation2]] %s5882_s6 }
   0x6   :  { %13 = vsyncpa [#allocation4], 0 }
   0x7   :  { %15 = vsyncpa [#allocation4 + $0x1], 0 }
   0x8   :  { %16 = vsyncpa [#allocation7], 0 }
   0x9   :  { %18 = vsyncpa [#allocation7 + $0x1], 0 }
   0xa   :  { %19 = vsyncpa [#allocation5], 0 }
   0xb   :  { %21 = vsyncpa [#allocation5 + $0x1], 0  ;;  %s4443_s26 = smov 0   ;;  %s4445_s27 = smov 0  }
   0xc   :  { %s4447_s28 = smov 0   ;;  %s4449_s29 = smov 0  }
   0xd   :  { %s4451_s30 = smov 0   ;;  %s4453_s8 = smov 0  }
   0xe   :  { %s4455_s9 = smov 0   ;;  %s4457_s6 = smov 0  }
   0xf LB: > { %5913 = sst [smem:[#allocation13_spill]] %s4359_s26  ;;  %s4484_s10 = sadd.s32 4294967295, %s4387_s6   ;;  %s4387_s6 = sphi %s4457_s6, %s27_s6   ;;  %s4383_s9 = sphi %s4455_s9, %s5980_s9   ;;  %s4379_s8 = sphi %s4453_s8, %s5979_s8   ;;  %s4375_s30 = sphi %s4451_s30, %s5978_s30   ;;  %s4371_s29 = sphi %s4449_s29, %s5977_s29   ;;  %s4367_s28 = sphi %s4447_s28, %s5976_s28   ;;  %s4363_s27 = sphi %s4445_s27, %s5975_s27   ;;  %s4359_s26 = sphi %s4443_s26, %s5974_s26  }
  0x10   : > { %5914 = sst [smem:[#allocation14_spill]] %s4367_s28  ;;  %s3749_s11 = sadd.s32 4294967294, %s4387_s6  }
  0x11   : > { %s36_s12 = sadd.s32 1, %s4379_s8  ;;  %s39_s13 = sadd.s32 1, %s4383_s9 }
  0x12   : > { %p37_p0 = scmp.ge.s32.totalorder %s36_s12, 2  ;;  %s102_s14 = sadd.s32 1, %s4367_s28 }
  0x13   : > { %p109_p1 = scmp.ne.s32.totalorder %s4367_s28, %s4363_s27  ;;  %p110_p2 = scmp.eq.s32.totalorder %s4387_s6, 0 }
  0x14   : > { %s5982_s12 = smov (%p37_p0, %s36_s12), 0  ;;  %s5984_s13 = smov (!%p37_p0, %s39_s13), %s4383_s9 }
  0x15   : > { %5915 = sst [smem:[#allocation15_spill]] %s5982_s12  ;;  %s98_s15 = ssub.s32 %s4379_s8, %s5982_s12 }
  0x16   : > { %p4498_p3 = por %p110_p2, %p109_p1  ;;  %p41_p4 = scmp.ge.s32.totalorder %s5984_s13, 2 }
  0x17   : > { %p115_p5 = scmp.ne.s32.totalorder %s4363_s27, %s4359_s26  ;;  %p116_p6 = scmp.eq.s32.totalorder %s4484_s10, 0 }
  0x18   : > { %p244_p7 = scmp.eq.s32.totalorder %s4484_s10, 3  ;;  %s5986_s13 = smov (%p41_p4, %s5984_s13), 0 }
  0x19   : > { %5917 = sst [smem:[#allocation16_spill]] %s5986_s13  ;;  %p4508_p8 = por %p116_p6, %p115_p5 }
  0x1a   : > { %p4512_p9 = por %p244_p7, %p109_p1  ;;  %s97_s19 = ssub.s32 %s4383_s9, %s5986_s13 }
  0x1b   : > { %p250_p10 = scmp.eq.s32.totalorder %s3749_s11, 3  ;;  %s99_s20 = sor.u32 %s98_s15, %s97_s19 }
  0x1c   : > { %s5919_s18 = scalar_select %p4512_p9, 1, 0 }
  0x1d   : > { %p100_p11 = scmp.eq.s32.totalorder %s99_s20, 0  ;;  %p4518_p12 = por %p250_p10, %p115_p5 }
  0x1e   : > { %5920 = sst [smem:[#allocation17_spill]] %s5919_s18  ;;  %p4019_p13 = scmp.lt.s32.totalorder %s4387_s6, 4 }
  0x1f   : > { %s5921_s21 = scalar_select %p4518_p12, 1, 0 }
  0x20   : > { %s4524_s22 = sand.u32 1, %s4367_s28   ;;  %p4531_p0 = pnand %p4019_p13, %p4498_p3 }
  0x21   : > { %5922 = sst [smem:[#allocation18_spill]] %s5921_s21  ;;  %s325_s25 = sand.u32 1, %s4387_s6  }
  0x22   : > { %s4527_s23 = scalar_select %p100_p11, %s4367_s28, %s102_s14  }
  0x23   : > { %s3755_s11 = sshll.u32 %s4524_s22, 6  ;;  %s3961_s15 = sshll.u32 %s4379_s8, 4 }
  0x24   : > { %5923 = sst [smem:[#allocation19_spill]] %s4527_s23  ;;  %s3758_s19 = sshll.u32 %s4383_s9, 5 }
  0x25   : > { %s335_s20 = sadd.s32 %s3961_s15, %s3758_s19  ;;  %s329_s13 = scalar_lea.vmem [#allocation6], %s3755_s11 }
  0x26   : > { %s340_s12 = sshll.u32 %s329_s13, 4  ;;  %s3759_s21 = sshll.u32 %s335_s20, 2  ;;  %s341_s12 = int_to_ptr.vmem [resolvable:$true] %s340_s12 }
  0x27   : > { %s5925_s4 = sld [smem:[#allocation38_spill]]  ;;  %s3764_s26 = sshll.u32 %s335_s20, 3 }
  0x28   : > { %s4542_s18 = scalar_lea.sflag [#allocation7], %s325_s25  ;;  %s4389_s7 = smov 64  }
  0x29   : > { %s4390_s15 = smov 4   ;;  %s5926_s5 = sld [smem:[#allocation39_spill]] }
  0x2a   : > { %p3765_p1 = scmp.ge.s32.totalorder %s4387_s6, 1  ;;  %p373_p2 = scmp.lt.s32.totalorder %s4387_s6, 5 }
  0x2b   : > { %s3753_s25 = sshll.u32 %s4379_s8, 3  ;;  %s3754_s20 = sshll.u32 %s4383_s9, 4 }
  0x2c   : > { %p4552_p3 = pnand %p3765_p1, %p373_p2  ;;  %s303_s14 = sadd.s32 %s3754_s20, %s3753_s25 }
  0x2d   : > { %s337_s23 = scalar_lea.hbm %s5925_s4, %s3759_s21  ;;  %s295_s13 = scalar_lea.sflag [#allocation4], %s4524_s22 }
  0x2e   : > { %s338_s28 = sshll.u32 %s337_s23, 4  ;;  %s3752_s23 = sshll.u32 %s4524_s22, 3  ;;  %s339_s28 = int_to_ptr.hbm [resolvable:$true] %s338_s28 }
  0x2f   : > { %4011 = dma.hbm_to_vmem [thread:$0]  (!%p4531_p0), %s339_s28, 1024, %s341_s12, %s4542_s18, %s4389_s7, %s4389_s7, %s4390_s15  }
  0x30   : > { %s362_s19 = scalar_lea.hbm %s5926_s5, %s3764_s26  ;;  %s298_s16 = scalar_lea.vmem [#allocation3], %s3752_s23 }
  0x31   : > { %s363_s3 = sshll.u32 %s362_s19, 4  ;;  %s307_s7 = sshll.u32 %s298_s16, 4  ;;  %s308_s7 = int_to_ptr.vmem [resolvable:$true] %s307_s7  ;;  %s364_s3 = int_to_ptr.hbm [resolvable:$true] %s363_s3 }
  0x32   : > { %s304_s26 = scalar_lea.hbm %s5878_s2, %s303_s14  ;;  %s4391_s11 = smov 16  }
  0x33   : > { %s305_s15 = sshll.u32 %s304_s26, 4  ;;  %s4392_s19 = smov 1   ;;  %s306_s15 = int_to_ptr.hbm [resolvable:$true] %s305_s15 }
  0x34   : > { %4008 = dma.hbm_to_vmem [thread:$0]  (!%p4531_p0), %s306_s15, 128, %s308_s7, %s295_s13, %s4391_s11, %s4391_s11, %s4392_s19  }
  0x35   : > { %s3760_s4 = sshll.u32 %s4524_s22, 7  ;;  %s4393_s23 = smov 128  }
  0x36   : > { %s354_s5 = scalar_lea.vmem [#allocation8], %s3760_s4  ;;  %s4394_s20 = smov 8  }
  0x37   : > { %s365_s25 = sshll.u32 %s354_s5, 4  ;;  %377 = sbr.rel (%p4552_p3) target bundleno = 983 (0x3d7), region = 48  ;;  %s366_s25 = int_to_ptr.vmem [resolvable:$true] %s365_s25 }
  0x38   : > { %4014 = dma.hbm_to_vmem [thread:$0]  (!%p4531_p0), %s364_s3, 2048, %s366_s25, %s4542_s18, %s4393_s23, %s4393_s23, %s4394_s20  }
  0x3c   : > { %s4572_s14 = sand.u32 1, %s4363_s27  }
  0x3d   : > { %s3766_s16 = sshll.u32 %s4572_s14, 3  ;;  %s380_s7 = scalar_lea.sflag [#allocation4], %s4572_s14 }
  0x3e   : > { %s4576_s22 = scalar_lea.vmem [#allocation3], %s3766_s16 }
  0x3f   : > { %4346 = dma.done.wait (%p4508_p8), %s380_s7, 128  }
  0x40   : > { %4348 = vsyncadd (%p4508_p8), %s380_s7, 4294967168  ;;  %s389_s3 = sand.u32 1, %s4484_s10   ;;  %s3767_s4 = sshll.u32 %s4572_s14, 6 }
  0x41   : > { %s390_s5 = scalar_lea.sflag [#allocation7], %s389_s3  ;;  %s4584_s18 = scalar_lea.vmem [#allocation6], %s3767_s4 }
  0x42   : > { %4350 = dma.done.wait (%p4508_p8), %s390_s5, 3072  }
  0x43   : > { %4352 = vsyncadd (%p4508_p8), %s390_s5, 4294964224  ;;  %s4591_s24 = sshll.u32 %s4371_s29, 3  ;;  %p465_p4 = scmp.lt.s32.totalorder %s4375_s30, 1  ;;  %vm686_vm0 = vcmask 1040384   ;;  %vm506_vm1 = vcmask 1047556   ;;  %vm682_vm2 = vcmask 15360  }
  0x44   : > { %p467_p5 = scmp.lt.s32.totalorder %s4591_s24, 15  ;;  %v4395_v2 = vmov 1983009808   ;;  %v4396_v18 = vmov 1934713408   ;;  %vm1222_vm4 = vcmask 130048  }
  0x45   : > { %s4596_s21 = scalar_select %p465_p4, %s4375_s30, 1  ;;  %v509_v3 = vunpack.c.l.s4 %v4395_v2  ;;  %v523_v19 = vunpack.c.l.s4 %v4396_v18 }
  0x46   : > { %s468_s10 = scalar_select %p467_p5, %s4591_s24, 15 }
  0x47   : > { %s3772_s28 = sshll.u32 %s4596_s21, 5  ;;  %s3774_s12 = sshll.u32 %s4596_s21, 4  ;;  %v4625_v17 = vunpack.c.0.s8 %v509_v3  ;;  %v4644_v40 = vunpack.c.0.s8 %v523_v19 }
  0x48   : > { %s3771_s26 = sshll.u32 %s468_s10, 1  ;;  %s4604_s13 = scalar_lea.vmem %s5877_s1, %s3774_s12 }
  0x49   : > { %s471_s11 = sadd.s32 %s3772_s28, %s3771_s26  ;;  %v666_v0 = vld [vmem:[%s4604_s13] sm:$0x1]  ;;  %v667_v1 = vld [vmem:[%s4604_s13 + $0x1] sm:$0x1]  ;;  %v668_v6 = vld [vmem:[%s4604_s13 + $0x2] sm:$0x1] }
  0x4a   : > { %s3773_s19 = sshll.u32 %s471_s11, 2  ;;  %v688_v4 = vsel %vm686_vm0, %v666_v0, 0  ;;  %v707_v5 = vsel %vm686_vm0, %v667_v1, 0  ;;  %v670_v7 = vld [vmem:[%s4604_s13 + $0x4] sm:$0x1]  ;;  %v726_v23 = vsel %vm686_vm0, %v668_v6, 0 }
  0x4b   : > { %s4611_s20 = scalar_lea.vmem %s5876_s0, %s3773_s19  ;;  %697 = vmatpush.bf16.msra.mxu0 %v688_v4  ;;  %716 = vmatpush.bf16.msra.mxu1 %v707_v5  ;;  %v764_v24 = vsel %vm686_vm0, %v670_v7, 0  ;;  %v669_v25 = vld [vmem:[%s4604_s13 + $0x3] sm:$0x1]  ;;  %v671_v29 = vld [vmem:[%s4604_s13 + $0x5] sm:$0x1]  ;;  %s3963_s16 = sshll.u32 %s4596_s21, 7 }
  0x4c   : > { %v489_v8 = vld [vmem:[%s4611_s20] sm:$0xf]  ;;  %v491_v9 = vld [vmem:[%s4611_s20 + $0x8] sm:$0xf]  ;;  %v493_v10 = vld [vmem:[%s4611_s20 + $0x10] sm:$0xf]  ;;  %735 = vmatpush.bf16.msra.mxu2 %v726_v23 }
  0x4d   : > { %v495_v11 = vld [vmem:[%s4611_s20 + $0x18] sm:$0xf]  ;;  %v497_v12 = vld [vmem:[%s4611_s20 + $0x20] sm:$0xf]  ;;  %v499_v13 = vld [vmem:[%s4611_s20 + $0x28] sm:$0xf] }
  0x4e   : > { %v501_v14 = vld [vmem:[%s4611_s20 + $0x30] sm:$0xf]  ;;  %v503_v15 = vld [vmem:[%s4611_s20 + $0x38] sm:$0xf]  ;;  %v505_v16 = vrot.slane %v497_v12, 4  ;;  %v534_v20 = vrot.slane %v499_v13, 4 }
  0x4f   : > { %v512_v21 = vrot.slane %v501_v14, 4  ;;  %v540_v22 = vrot.slane %v503_v15, 4  ;;  %773 = vmatpush.bf16.msrb.mxu0 %v764_v24  ;;  %v745_v28 = vsel %vm686_vm0, %v669_v25, 0  ;;  %v673_v30 = vld [vmem:[%s4604_s13 + $0x7] sm:$0x1]  ;;  %v783_v38 = vsel %vm686_vm0, %v671_v29, 0 }
  0x50   : > { %v507_v26 = vsel %vm506_vm1, %v505_v16, %v489_v8  ;;  %v535_v27 = vsel %vm506_vm1, %v534_v20, %v491_v9  ;;  %754 = vmatpush.bf16.msra.mxu3 %v745_v28  ;;  %v672_v35 = vld [vmem:[%s4604_s13 + $0x6] sm:$0x1]  ;;  %v821_v39 = vsel %vm686_vm0, %v673_v30, 0  ;;  %792 = vmatpush.bf16.msrb.mxu1 %v783_v38  ;;  %v674_v44 = vld [vmem:[%s4604_s13 + $0x8] sm:$0x1]  ;;  %s5948_s3 = sld [smem:[#allocation37_spill]] }
  0x51   : > { %v511_v31 = vperm.slane %v507_v26, %v4625_v17  ;;  %v513_v32 = vsel %vm506_vm1, %v512_v21, %v493_v10  ;;  %v539_v33 = vperm.slane %v535_v27, %v4625_v17  ;;  %v541_v34 = vsel %vm506_vm1, %v540_v22, %v495_v11  ;;  %v675_v51 = vld [vmem:[%s4604_s13 + $0x9] sm:$0x1]  ;;  %v502_v57 = vld [vmem:[%s4611_s20 + $0x34] sm:$0xf]  ;;  %v677_v60 = vld [vmem:[%s4604_s13 + $0xb] sm:$0x1] }
  0x52   : > { %v517_v36 = vperm.slane %v513_v32, %v4625_v17  ;;  %v545_v37 = vperm.slane %v541_v34, %v4625_v17  ;;  %v802_v41 = vsel %vm686_vm0, %v672_v35, 0  ;;  %v840_v52 = vsel %vm686_vm0, %v674_v44, 0  ;;  %v676_v61 = vld [vmem:[%s4604_s13 + $0xa] sm:$0x1]  ;;  %v494_v2 = vld [vmem:[%s4611_s20 + $0x14] sm:$0xf] }
  0x53   : > { %811 = vmatpush.bf16.msrb.mxu2 %v802_v41  ;;  %v520_v47 = vrot.slane %v511_v31, 4  ;;  %v548_v49 = vrot.slane %v539_v33, 4  ;;  %v859_v59 = vsel %vm686_vm0, %v675_v51, 0  ;;  %v504_v3 = vld [vmem:[%s4611_s20 + $0x3c] sm:$0xf]  ;;  %v568_v7 = vrot.slane %v502_v57, 4 }
  0x54   : > { %830 = vmatpush.bf16.msrb.mxu3 %v821_v39  ;;  %v518_v42 = vrot.slane %v517_v36, 4  ;;  %v546_v43 = vrot.slane %v545_v37, 4  ;;  %v496_v6 = vld [vmem:[%s4611_s20 + $0x1c] sm:$0xf]  ;;  %v878_v10 = vsel %vm686_vm0, %v676_v61, 0  ;;  %v596_v15 = vrot.slane %v504_v3, 4 }
  0x55   : > { %v521_v0 = vsel %vm506_vm1, %v517_v36, %v520_v47  ;;  %v549_v1 = vsel %vm506_vm1, %v545_v37, %v548_v49  ;;  %v498_v11 = vld [vmem:[%s4611_s20 + $0x24] sm:$0xf]  ;;  %v500_v12 = vld [vmem:[%s4611_s20 + $0x2c] sm:$0xf]  ;;  %v897_v18 = vsel %vm686_vm0, %v677_v60, 0  ;;  %v569_v20 = vsel %vm506_vm1, %v568_v7, %v494_v2  ;;  %s3368_s5 = sld [smem:[#allocation2]] }
  0x56   : > { %v519_v45 = vsel %vm506_vm1, %v518_v42, %v511_v31  ;;  %v547_v46 = vsel %vm506_vm1, %v546_v43, %v539_v33  ;;  %v529_v13 = vperm.slane %v521_v0, %v4644_v40  ;;  %v557_v14 = vperm.slane %v549_v1, %v4644_v40  ;;  %v490_v23 = vld [vmem:[%s4611_s20 + $0x4] sm:$0xf]  ;;  %v492_v24 = vld [vmem:[%s4611_s20 + $0xc] sm:$0xf]  ;;  %v1014_v0 = vld [vmem:[%s4576_s22] sm:$0x1]  ;;  %s5246_s4 = scalar_lea.vmem %s5948_s3, %s3963_s16 }
  0x57   : > { %v525_v48 = vperm.slane %v519_v45, %v4644_v40  ;;  %v553_v50 = vperm.slane %v547_v46, %v4644_v40  ;;  %v562_v19 = vrot.slane %v498_v11, 4  ;;  %v590_v21 = vrot.slane %v500_v12, 4  ;;  %v678_v36 = vld [vmem:[%s4604_s13 + $0xc] sm:$0x1]  ;;  %v679_v42 = vld [vmem:[%s4604_s13 + $0xd] sm:$0x1] }
  0x58   : > { %v597_v22 = vsel %vm506_vm1, %v596_v15, %v496_v6  ;;  %v532_v25 = vrot.slane %v529_v13, 4  ;;  %v560_v26 = vrot.slane %v557_v14, 4  ;;  %v573_v27 = vperm.slane %v569_v20, %v4625_v17  ;;  %v680_v47 = vld [vmem:[%s4604_s13 + $0xe] sm:$0x1]  ;;  %s3996_s10 = sshll.u32 %s4371_s29, 4  ;;  %s3957_s28 = sshll.u32 %s4375_s30, 5 }
  0x59   : > { %v620_v53 = vpack.i.b16 %v553_v50, %v525_v48  ;;  %v621_v54 = vshrl.u32 %v525_v48, 16  ;;  %v622_v55 = vshrl.u32 %v553_v50, 16  ;;  %v530_v56 = vrot.slane %v525_v48, 4  ;;  %s3559_s12 = sadd.s32 %s3996_s10, %s3957_s28  ;;  %s5966_s15 = sld [smem:[#allocation40_spill]] }
  0x5a   : > { %v558_v58 = vrot.slane %v553_v50, 4  ;;  %v601_v28 = vperm.slane %v597_v22, %v4625_v17  ;;  %v563_v29 = vsel %vm506_vm1, %v562_v19, %v490_v23  ;;  %v591_v30 = vsel %vm506_vm1, %v590_v21, %v492_v24  ;;  %s3958_s29 = sshll.u32 %s3559_s12, 3  ;;  %s3547_s25 = scalar_lea.sflag [#allocation5], %s4572_s14 }
  0x5b   : > { %3777 = vmatmul.msk.bf16.vlgmr.msra.gmra.mxu0 %vm682_vm2, %v620_v53  ;;  %v623_v62 = vpack.i.b16 %v622_v55, %v621_v54  ;;  %v531_v63 = vsel %vm506_vm1, 0, %v530_v56  ;;  %v633_v31 = vshrl.u32 %v529_v13, 16  ;;  %v634_v32 = vshrl.u32 %v557_v14, 16 }
  0x5c   : > { %v559_v4 = vsel %vm506_vm1, 0, %v558_v58  ;;  %v627_v5 = vshrl.u32 %v531_v63, 16  ;;  %849 = vmatpush.bf16.msra.mxu0 %v840_v52  ;;  %v632_v33 = vpack.i.b16 %v557_v14, %v529_v13  ;;  %v533_v34 = vsel %vm506_vm1, 0, %v532_v25  ;;  %v681_v52 = vld [vmem:[%s4604_s13 + $0xf] sm:$0x1] }
  0x5d   : > { %3778 = vmatmul.msk.bf16.vlgmr.msra.gmra.mxu1 %vm682_vm2, %v623_v62  ;;  %v626_v8 = vpack.i.b16 %v559_v4, %v531_v63  ;;  %v628_v9 = vshrl.u32 %v559_v4, 16  ;;  %v561_v35 = vsel %vm506_vm1, 0, %v560_v26  ;;  %v567_v37 = vperm.slane %v563_v29, %v4625_v17  ;;  %v1015_v4 = vld [vmem:[%s4576_s22 + $0x1] sm:$0x1]  ;;  %v1017_v14 = vld [vmem:[%s4576_s22 + $0x3] sm:$0x1] }
  0x5e   : > { %868 = vmatpush.bf16.msra.mxu1 %v859_v59  ;;  %v574_v38 = vrot.slane %v573_v27, 4  ;;  %v595_v39 = vperm.slane %v591_v30, %v4625_v17  ;;  %v602_v41 = vrot.slane %v601_v28, 4  ;;  %v635_v43 = vpack.i.b16 %v634_v32, %v633_v31  ;;  %v1019_v29 = vld [vmem:[%s4576_s22 + $0x5] sm:$0x1] }
  0x5f   : > { %3779 = vmatmul.msk.bf16.vlgmr.msra.gmra.mxu2 %vm682_vm2, %v626_v8  ;;  %v629_v16 = vpack.i.b16 %v628_v9, %v627_v5  ;;  %v639_v44 = vshrl.u32 %v533_v34, 16  ;;  %v640_v45 = vshrl.u32 %v561_v35, 16  ;;  %v916_v46 = vsel %vm686_vm0, %v678_v36, 0  ;;  %v1016_v9 = vld [vmem:[%s4576_s22 + $0x2] sm:$0x1]  ;;  %s3561_s17 = scalar_lea.hbm %s5966_s15, %s3958_s29 }
  0x60   : > { %887 = vmatpush.bf16.msra.mxu2 %v878_v10  ;;  %v638_v48 = vpack.i.b16 %v561_v35, %v533_v34  ;;  %v575_v49 = vsel %vm506_vm1, %v574_v38, %v567_v37  ;;  %v603_v50 = vsel %vm506_vm1, %v602_v41, %v595_v39  ;;  %v935_v51 = vsel %vm686_vm0, %v679_v42, 0  ;;  %v1020_v36 = vld [vmem:[%s4576_s22 + $0x6] sm:$0x1]  ;;  %s3564_s19 = sshll.u32 %s3561_s17, 4  ;;  %s3565_s19 = int_to_ptr.hbm [resolvable:$true] %s3564_s19 }
  0x61   : > { %3780 = vmatmul.msk.bf16.vlgmr.msra.gmra.mxu3 %vm682_vm2, %v629_v16  ;;  %v641_v53 = vpack.i.b16 %v640_v45, %v639_v44  ;;  %v954_v54 = vsel %vm686_vm0, %v680_v47, 0  ;;  %v581_v55 = vperm.slane %v575_v49, %v4644_v40  ;;  %v609_v56 = vperm.slane %v603_v50, %v4644_v40  ;;  %v3964_v42 = vld [vmem:[%s4611_s20] sm:$0xff]  ;;  %v3966_v44 = vld [vmem:[%s4611_s20 + $0x10] sm:$0xff]  ;;  %v3967_v45 = vld [vmem:[%s4611_s20 + $0x18] sm:$0xff]  ;;  %s4299_s23 = sshra.s32 %s3565_s19, 4  ;;  %s4300_s23 = int_to_ptr.hbm [resolvable:$true] %s4299_s23 }
  0x62   : > { %906 = vmatpush.bf16.msra.mxu3 %v897_v18  ;;  %v973_v57 = vsel %vm686_vm0, %v681_v52, 0  ;;  %v576_v2 = vrot.slane %v567_v37, 4  ;;  %v604_v3 = vrot.slane %v595_v39, 4  ;;  %v1031_v8 = vsel %vm686_vm0, %v1014_v0, 0  ;;  %v1021_v39 = vld [vmem:[%s4576_s22 + $0x7] sm:$0x1]  ;;  %p4306_p10 = scmp.lt.s32.totalorder %s4300_s23, %s5966_s15 }
  0x63   : > { %v586_v58 = vrot.slane %v581_v55, 4  ;;  %v614_v59 = vrot.slane %v609_v56, 4  ;;  %v645_v60 = vshrl.u32 %v581_v55, 16  ;;  %v646_v61 = vshrl.u32 %v609_v56, 16  ;;  %v3969_v47 = vld [vmem:[%s4611_s20 + $0x28] sm:$0xff]  ;;  %v3971_v49 = vld [vmem:[%s4611_s20 + $0x38] sm:$0xff] }
  0x64   : > { %v644_v1 = vpack.i.b16 %v609_v56, %v581_v55  ;;  %v577_v11 = vsel %vm506_vm1, %v573_v27, %v576_v2  ;;  %v605_v12 = vsel %vm506_vm1, %v601_v28, %v604_v3  ;;  %v1056_v13 = vsel %vm686_vm0, %v1015_v4, 0  ;;  %v1018_v27 = vld [vmem:[%s4576_s22 + $0x4] sm:$0x1]  ;;  %s4305_s22 = scalar_lea.hbm %s5966_s15, 512 }
  0x65   : > { %v587_v62 = vsel %vm506_vm1, 0, %v586_v58  ;;  %v615_v63 = vsel %vm506_vm1, 0, %v614_v59  ;;  %v647_v5 = vpack.i.b16 %v646_v61, %v645_v60  ;;  %v1081_v16 = vsel %vm686_vm0, %v1016_v9, 0 }
  0x66   : > { %v651_v6 = vshrl.u32 %v587_v62, 16  ;;  %v652_v7 = vshrl.u32 %v615_v63, 16  ;;  %v650_v10 = vpack.i.b16 %v615_v63, %v587_v62  ;;  %v585_v18 = vperm.slane %v577_v11, %v4644_v40 }
  0x67   : > { %v613_v19 = vperm.slane %v605_v12, %v4644_v40  ;;  %v1106_v20 = vsel %vm686_vm0, %v1017_v14, 0  ;;  %v1156_v35 = vsel %vm686_vm0, %v1019_v29, 0  ;;  %v1181_v38 = vsel %vm686_vm0, %v1020_v36, 0 }
  0x68   : > { %v653_v15 = vpack.i.b16 %v652_v7, %v651_v6  ;;  %v588_v21 = vrot.slane %v585_v18, 4  ;;  %v657_v23 = vshrl.u32 %v585_v18, 16  ;;  %v1206_v41 = vsel %vm686_vm0, %v1021_v39, 0 }
  0x69   : > { %v616_v22 = vrot.slane %v613_v19, 4  ;;  %v658_v24 = vshrl.u32 %v613_v19, 16  ;;  %v656_v28 = vpack.i.b16 %v613_v19, %v585_v18  ;;  %v988_v50 = vlaneseq }
  0x6a   : > { %v589_v25 = vsel %vm506_vm1, 0, %v588_v21  ;;  %v991_v52 = vstv %s4591_s24 }
  0x6b   : > { %3781 = vmatmul.msk.bf16.vlgmr.msrb.gmra.mxu0 %vm682_vm2, %v632_v33  ;;  %v617_v26 = vsel %vm506_vm1, 0, %v616_v22  ;;  %v659_v30 = vpack.i.b16 %v658_v24, %v657_v23  ;;  %v663_v31 = vshrl.u32 %v589_v25, 16  ;;  %v1131_v33 = vsel %vm686_vm0, %v1018_v27, 0 }
  0x6c   : > { %925 = vmatpush.bf16.msrb.mxu0 %v916_v46  ;;  %v664_v32 = vshrl.u32 %v617_v26, 16  ;;  %v662_v34 = vpack.i.b16 %v617_v26, %v589_v25  ;;  %v3968_v46 = vld [vmem:[%s4611_s20 + $0x20] sm:$0xff] }
  0x6d   : > { %3782 = vmatmul.msk.bf16.vlgmr.msrb.gmra.mxu1 %vm682_vm2, %v635_v43  ;;  %v3965_v43 = vld [vmem:[%s4611_s20 + $0x8] sm:$0xff] }
  0x6e   : > { %944 = vmatpush.bf16.msrb.mxu1 %v935_v51  ;;  %v665_v37 = vpack.i.b16 %v664_v32, %v663_v31  ;;  %v989_v51 = vshrl.u32 %v988_v50, 7 }
  0x6f   : > { %3783 = vmatmul.msk.bf16.vlgmr.msrb.gmra.mxu2 %vm682_vm2, %v638_v48  ;;  %v3970_v48 = vld [vmem:[%s4611_s20 + $0x30] sm:$0xff]  ;;  %s4301_s20 = scalar_lea.hbm %s4300_s23, 128 }
  0x70   : > { %963 = vmatpush.bf16.msrb.mxu2 %v954_v54  ;;  %v994_v54 = vand.u32 127, %v988_v50  ;;  %p4302_p6 = scmp.ne.s32.totalorder %s4300_s23, %s4301_s20  ;;  %p4307_p11 = scmp.lt.s32.totalorder %s4305_s22, %s4301_s20 }
  0x71   : > { %3784 = vmatmul.msk.bf16.vlgmr.msrb.gmra.mxu3 %vm682_vm2, %v641_v53  ;;  %v992_v53 = vadd.s32 %v991_v52, %v989_v51 }
  0x72   : > { %982 = vmatpush.bf16.msrb.mxu3 %v973_v57  ;;  %p4303_p7 = pnand %p4302_p6, %p4512_p9  ;;  %p4308_p13 = por %p4307_p11, %p4306_p10 }
  0x73   : > { %vm4752_vm3 = vcmp.eq.s32.totalorder %v992_v53, %v994_v54 }
  0x74   : > { %p4304_p8 = pneg %p4303_p7 }
  0x76   : > { %p4309_p0 = pnand %p4308_p13, %p4304_p8 }
  0x7b   : > { %3785 = vmatmul.msk.bf16.vlgmr.msra.gmra.mxu0 %vm682_vm2, %v644_v1 }
  0x7c   : > { %1040 = vmatpush.bf16.msra.mxu0 %v1031_v8 }
  0x7d   : > { %3786 = vmatmul.msk.bf16.vlgmr.msra.gmra.mxu1 %vm682_vm2, %v647_v5 }
  0x7e   : > { %1065 = vmatpush.bf16.msra.mxu1 %v1056_v13 }
  0x7f   : > { %3787 = vmatmul.msk.bf16.vlgmr.msra.gmra.mxu2 %vm682_vm2, %v650_v10 }
  0x80   : > { %1090 = vmatpush.bf16.msra.mxu2 %v1081_v16 }
  0x81   : > { %3788 = vmatmul.msk.bf16.vlgmr.msra.gmra.mxu3 %vm682_vm2, %v653_v15 }
  0x82   : > { %1115 = vmatpush.bf16.msra.mxu3 %v1106_v20 }
  0x8b   : > { %3789 = vmatmul.msk.bf16.vlgmr.msrb.gmra.mxu0 %vm682_vm2, %v656_v28 }
  0x8c   : > { %1140 = vmatpush.bf16.msrb.mxu0 %v1131_v33 }
  0x8d   : > { %3790 = vmatmul.msk.bf16.vlgmr.msrb.gmra.mxu1 %vm682_vm2, %v659_v30 }
  0x8e   : > { %1165 = vmatpush.bf16.msrb.mxu1 %v1156_v35 }
  0x8f   : > { %3791 = vmatmul.msk.bf16.vlgmr.msrb.gmra.mxu2 %vm682_vm2, %v662_v34 }
  0x90   : > { %1190 = vmatpush.bf16.msrb.mxu2 %v1181_v38 }
  0x91   : > { %3792 = vmatmul.msk.bf16.vlgmr.msrb.gmra.mxu3 %vm682_vm2, %v665_v37 }
  0x92   : > { %1215 = vmatpush.bf16.msrb.mxu3 %v1206_v41 }
  0x9b   : > { %3798 = vmatmul.msk.bf16.vlgmr.msra.gmra.mxu0 %vm682_vm2, %v3964_v42 }
  0x9d   : > { %3803 = vmatmul.msk.bf16.vlgmr.msra.gmra.mxu1 %vm682_vm2, %v3965_v43 }
  0x9f   : > { %3808 = vmatmul.msk.bf16.vlgmr.msra.gmra.mxu2 %vm682_vm2, %v3966_v44 }
  0xa1   : > { %3813 = vmatmul.msk.bf16.vlgmr.msra.gmra.mxu3 %vm682_vm2, %v3967_v45 }
  0xab   : > { %3818 = vmatmul.msk.bf16.vlgmr.msrb.gmra.mxu0 %vm682_vm2, %v3968_v46 }
  0xad   : > { %3823 = vmatmul.msk.bf16.vlgmr.msrb.gmra.mxu1 %vm682_vm2, %v3969_v47 }
  0xaf   : > { %3828 = vmatmul.msk.bf16.vlgmr.msrb.gmra.mxu2 %vm682_vm2, %v3970_v48 }
  0xb1   : > { %3833 = vmatmul.msk.bf16.vlgmr.msrb.gmra.mxu3 %vm682_vm2, %v3971_v49 }
  0xd8   : > { %v699_v56 = vpop.f32.mrf.mxu0 }
  0xd9   : > { %v4758_v57 = vsel %vm4752_vm3, -inf, %v699_v56 }
  0xda   : > { %v718_v58 = vpop.f32.mrf.mxu1  ;;  %v1223_v59 = vsel %vm1222_vm4, %v4758_v57, -inf }
  0xdb   : > { %1224 = vmax.xlane.f32.xlu0 %v1223_v59  ;;  %v4764_v60 = vsel %vm4752_vm3, -inf, %v718_v58 }
  0xdc   : > { %v1226_v0 = vsel %vm1222_vm4, %v4764_v60, -inf }
  0xe0   : > { %v701_v61 = vpop.f32.mrf.mxu0 }
  0xe2   : > { %v737_v62 = vpop.f32.mrf.mxu2  ;;  %v720_v63 = vpop.f32.mrf.mxu1 }
  0xe3   : > { %v4770_v1 = vsel %vm4752_vm3, -inf, %v737_v62  ;;  %1227 = vmax.xlane.f32.xlu0 %v1226_v0 }
  0xe4   : > { %v756_v2 = vpop.f32.mrf.mxu3  ;;  %v1229_v3 = vsel %vm1222_vm4, %v4770_v1, -inf }
  0xe5   : > { %1230 = vmax.xlane.f32.xlu1 %v1229_v3  ;;  %v4776_v5 = vsel %vm4752_vm3, -inf, %v756_v2 }
  0xe6   : > { %v1232_v11 = vsel %vm1222_vm4, %v4776_v5, -inf }
  0xe8   : > { %v775_v4 = vpop.f32.mrf.mxu0 }
  0xe9   : > { %v4780_v6 = vsel %vm4752_vm3, -inf, %v775_v4 }
  0xea   : > { %v739_v7 = vpop.f32.mrf.mxu2  ;;  %v794_v8 = vpop.f32.mrf.mxu1  ;;  %v1235_v9 = vsel %vm1222_vm4, %v4780_v6, -inf }
  0xeb   : > { %1236 = vmax.xlane.f32.xlu2 %v1235_v9  ;;  %v4788_v12 = vsel %vm4752_vm3, -inf, %v794_v8 }
  0xec   : > { %v758_v10 = vpop.f32.mrf.mxu3  ;;  %v1238_v16 = vsel %vm1222_vm4, %v4788_v12, -inf }
  0xed   : > { %1233 = vmax.xlane.f32.xlu1 %v1232_v11 }
  0xf0   : > { %v777_v13 = vpop.f32.mrf.mxu0 }
  0xf2   : > { %v813_v14 = vpop.f32.mrf.mxu2  ;;  %v796_v15 = vpop.f32.mrf.mxu1 }
  0xf3   : > { %v4794_v18 = vsel %vm4752_vm3, -inf, %v813_v14  ;;  %1239 = vmax.xlane.f32.xlu2 %v1238_v16 }
  0xf4   : > { %v832_v19 = vpop.f32.mrf.mxu3  ;;  %v1241_v20 = vsel %vm1222_vm4, %v4794_v18, -inf }
  0xf5   : > { %v4800_v21 = vsel %vm4752_vm3, -inf, %v832_v19  ;;  %1242 = vmax.xlane.f32.xlu0 %v1241_v20 }
  0xf6   : > { %v1244_v22 = vsel %vm1222_vm4, %v4800_v21, -inf }
  0xf7   : > { %1245 = vmax.xlane.f32.xlu1 %v1244_v22 }
  0xf8   : > { %v851_v23 = vpop.f32.mrf.mxu0 }
  0xf9   : > { %v4806_v24 = vsel %vm4752_vm3, -inf, %v851_v23 }
  0xfa   : > { %5930 = vst [vmem:[#allocation20_spill] sm:$0xff] %v4806_v24  ;;  %v815_v25 = vpop.f32.mrf.mxu2  ;;  %v870_v26 = vpop.f32.mrf.mxu1  ;;  %v1247_v27 = vsel %vm1222_vm4, %v4806_v24, -inf }
  0xfb   : > { %v4812_v28 = vsel %vm4752_vm3, -inf, %v870_v26  ;;  %1248 = vmax.xlane.f32.xlu2 %v1247_v27 }
  0xfc   : > { %v834_v29 = vpop.f32.mrf.mxu3  ;;  %v1250_v30 = vsel %vm1222_vm4, %v4812_v28, -inf }
  0xfd   : > { %1251 = vmax.xlane.f32.xlu0 %v1250_v30 }
 0x100   : > { %v853_v31 = vpop.f32.mrf.mxu0 }
 0x102   : > { %v889_v32 = vpop.f32.mrf.mxu2  ;;  %v872_v33 = vpop.f32.mrf.mxu1 }
 0x103   : > { %v4818_v34 = vsel %vm4752_vm3, -inf, %v889_v32 }
 0x104   : > { %5931 = vst [vmem:[#allocation21_spill] sm:$0xff] %v4818_v34  ;;  %v908_v35 = vpop.f32.mrf.mxu3  ;;  %v1253_v36 = vsel %vm1222_vm4, %v4818_v34, -inf }
 0x105   : > { %v4824_v37 = vsel %vm4752_vm3, -inf, %v908_v35  ;;  %1254 = vmax.xlane.f32.xlu1 %v1253_v36 }
 0x106   : > { %v1256_v38 = vsel %vm1222_vm4, %v4824_v37, -inf }
 0x107   : > { %1257 = vmax.xlane.f32.xlu2 %v1256_v38 }
 0x108   : > { %v927_v39 = vpop.f32.mrf.mxu0 }
 0x109   : > { %v4830_v41 = vsel %vm4752_vm3, -inf, %v927_v39 }
 0x10a   : > { %5932 = vst [vmem:[#allocation22_spill] sm:$0xff] %v4830_v41  ;;  %v891_v42 = vpop.f32.mrf.mxu2  ;;  %v946_v43 = vpop.f32.mrf.mxu1  ;;  %v1259_v44 = vsel %vm1222_vm4, %v4830_v41, -inf }
 0x10b   : > { %v4836_v45 = vsel %vm4752_vm3, -inf, %v946_v43  ;;  %1260 = vmax.xlane.f32.xlu0 %v1259_v44 }
 0x10c   : > { %5933 = vst [vmem:[#allocation23_spill] sm:$0xff] %v4836_v45  ;;  %v910_v46 = vpop.f32.mrf.mxu3  ;;  %v1262_v47 = vsel %vm1222_vm4, %v4836_v45, -inf }
 0x10d   : > { %1263 = vmax.xlane.f32.xlu1 %v1262_v47 }
 0x110   : > { %v929_v48 = vpop.f32.mrf.mxu0 }
 0x112   : > { %v965_v49 = vpop.f32.mrf.mxu2  ;;  %v948_v50 = vpop.f32.mrf.mxu1 }
 0x113   : > { %v4842_v51 = vsel %vm4752_vm3, -inf, %v965_v49 }
 0x114   : > { %5934 = vst [vmem:[#allocation24_spill] sm:$0xff] %v4842_v51  ;;  %v984_v52 = vpop.f32.mrf.mxu3  ;;  %v1265_v53 = vsel %vm1222_vm4, %v4842_v51, -inf }
 0x115   : > { %v4848_v54 = vsel %vm4752_vm3, -inf, %v984_v52  ;;  %1266 = vmax.xlane.f32.xlu2 %v1265_v53 }
 0x116   : > { %v1268_v56 = vsel %vm1222_vm4, %v4848_v54, -inf }
 0x117   : > { %1269 = vmax.xlane.f32.xlu0 %v1268_v56 }
 0x118   : > { %v4852_v58 = vpop.f32.mrf.mxu0 }
 0x119   : > { %v1271_v59 = vsel %vm1222_vm4, %v4852_v58, -inf }
 0x11a   : > { %v967_v61 = vpop.f32.mrf.mxu2  ;;  %v4856_v62 = vpop.f32.mrf.mxu1  ;;  %1272 = vmax.xlane.f32.xlu1 %v1271_v59 }
 0x11b   : > { %v1277_v55 = vsel %vm1222_vm4, %v4856_v62, -inf }
 0x11c   : > { %v986_v63 = vpop.f32.mrf.mxu3 }
 0x11f   : > { %1278 = vmax.xlane.f32.xlu0 %v1277_v55 }
 0x120   : > { %v4860_v0 = vpop.f32.mrf.mxu0 }
 0x121   : > { %v1274_v2 = vsel %vm1222_vm4, %v4860_v0, -inf }
 0x122   : > { %v4864_v3 = vpop.f32.mrf.mxu2  ;;  %v4866_v4 = vpop.f32.mrf.mxu1  ;;  %1275 = vmax.xlane.f32.xlu2 %v1274_v2 }
 0x123   : > { %5935 = vst [vmem:[#allocation25_spill] sm:$0xff] %v4864_v3  ;;  %v1280_v7 = vsel %vm1222_vm4, %v4866_v4, -inf  ;;  %v1283_v9 = vsel %vm1222_vm4, %v4864_v3, -inf }
 0x124   : > { %1281 = vmax.xlane.f32.xlu1 %v1280_v7  ;;  %v4870_v8 = vpop.f32.mrf.mxu3 }
 0x125   : > { %5936 = vst [vmem:[#allocation26_spill] sm:$0xff] %v4870_v8  ;;  %v1289_v13 = vsel %vm1222_vm4, %v4870_v8, -inf }
 0x128   : > { %v4874_v10 = vpop.f32.mrf.mxu0 }
 0x129   : > { %5937 = vst [vmem:[#allocation27_spill] sm:$0xff] %v4874_v10  ;;  %v1295_v11 = vsel %vm1222_vm4, %v4874_v10, -inf }
 0x12a   : > { %1296 = vmax.xlane.f32.xlu0 %v1295_v11  ;;  %1284 = vmax.xlane.f32.xlu2 %v1283_v9  ;;  %v4880_v14 = vpop.f32.mrf.mxu2  ;;  %v4882_v15 = vpop.f32.mrf.mxu1 }
 0x12b   : > { %5938 = vst [vmem:[#allocation28_spill] sm:$0xff] %v4880_v14  ;;  %v1301_v19 = vsel %vm1222_vm4, %v4882_v15, -inf  ;;  %v1286_v22 = vsel %vm1222_vm4, %v4880_v14, -inf }
 0x12c   : > { %5939 = vst [vmem:[#allocation29_spill] sm:$0xff] %v4882_v15  ;;  %1290 = vmax.xlane.f32.xlu1 %v1289_v13  ;;  %v4884_v16 = vpop.f32.mrf.mxu3 }
 0x12d   : > { %5940 = vst [vmem:[#allocation30_spill] sm:$0xff] %v4884_v16  ;;  %v1292_v29 = vsel %vm1222_vm4, %v4884_v16, -inf }
 0x130   : > { %v4888_v20 = vpop.f32.mrf.mxu0 }
 0x131   : > { %5941 = vst [vmem:[#allocation31_spill] sm:$0xff] %v4888_v20  ;;  %v1298_v23 = vsel %vm1222_vm4, %v4888_v20, -inf }
 0x132   : > { %1302 = vmax.xlane.f32.xlu2 %v1301_v19  ;;  %1287 = vmax.xlane.f32.xlu0 %v1286_v22  ;;  %v4894_v25 = vpop.f32.mrf.mxu2  ;;  %v4896_v26 = vpop.f32.mrf.mxu1 }
 0x133   : > { %5942 = vst [vmem:[#allocation32_spill] sm:$0xff] %v4894_v25  ;;  %v1304_v30 = vsel %vm1222_vm4, %v4896_v26, -inf  ;;  %v1307_v31 = vsel %vm1222_vm4, %v4894_v25, -inf }
 0x134   : > { %1299 = vmax.xlane.f32.xlu1 %v1298_v23  ;;  %5943 = vst [vmem:[#allocation33_spill] sm:$0xff] %v4896_v26  ;;  %v4898_v27 = vpop.f32.mrf.mxu3 }
 0x135   : > { %5944 = vst [vmem:[#allocation34_spill] sm:$0xff] %v4898_v27  ;;  %v1313_v33 = vsel %vm1222_vm4, %v4898_v27, -inf }
 0x13a   : > { %1293 = vmax.xlane.f32.xlu2 %v1292_v29  ;;  %1305 = vmax.xlane.f32.xlu0 %v1304_v30  ;;  %v4906_v32 = vpop.f32.mrf.mxu2 }
 0x13b   : > { %5945 = vst [vmem:[#allocation35_spill] sm:$0xff] %v4906_v32  ;;  %v1310_v36 = vsel %vm1222_vm4, %v4906_v32, -inf }
 0x13c   : > { %1308 = vmax.xlane.f32.xlu1 %v1307_v31  ;;  %v4910_v35 = vpop.f32.mrf.mxu3 }
 0x13d   : > { %5946 = vst [vmem:[#allocation36_spill] sm:$0xff] %v4910_v35  ;;  %v1316_v38 = vsel %vm1222_vm4, %v4910_v35, -inf }
 0x142   : > { %1314 = vmax.xlane.f32.xlu0 %v1313_v33  ;;  %1311 = vmax.xlane.f32.xlu2 %v1310_v36 }
 0x144   : > { %1317 = vmax.xlane.f32.xlu1 %v1316_v38 }
 0x14e   : > { %v1225_v39 = vpop.xlane.xlu0 %1224 }
 0x14f   : > { %v1322_v55 = vrot.slane %v1225_v39, 4 }
 0x156   : > { %v1228_v44 = vpop.xlane.xlu0 %1227 }
 0x157   : > { %v1334_v63 = vrot.slane %v1228_v44, 4 }
 0x158   : > { %v1231_v42 = vpop.xlane.xlu1 %1230 }
 0x159   : > { %v1319_v2 = vrot.slane %v1231_v42, 4  ;;  %v1323_v13 = vsel %vm506_vm1, %v1231_v42, %v1322_v55 }
 0x15a   : > { %v1331_v33 = vperm.slane %v1323_v13, %v4625_v17 }
 0x15b   : > { %v1321_v23 = vsel %vm506_vm1, %v1319_v2, %v1225_v39 }
 0x15e   : > { %v1237_v43 = vpop.xlane.xlu2 %1236 }
 0x15f   : > { %v1346_v29 = vrot.slane %v1237_v43, 4 }
 0x160   : > { %v1234_v46 = vpop.xlane.xlu1 %1233 }
 0x161   : > { %v1332_v9 = vrot.slane %v1234_v46, 4  ;;  %v1335_v11 = vsel %vm506_vm1, %v1234_v46, %v1334_v63  ;;  %v1327_v63 = vperm.slane %v1321_v23, %v4625_v17 }
 0x162   : > { %v1343_v30 = vperm.slane %v1335_v11, %v4625_v17 }
 0x163   : > { %v1333_v36 = vsel %vm506_vm1, %v1332_v9, %v1228_v44  ;;  %v1370_v13 = vrot.slane %v1327_v63, 4 }
 0x164   : > { %v1339_v2 = vperm.slane %v1333_v36, %v4625_v17  ;;  %v1380_v11 = vrot.slane %v1343_v30, 4 }
 0x166   : > { %v1240_v47 = vpop.xlane.xlu2 %1239  ;;  %v1381_v23 = vsel %vm506_vm1, %v1380_v11, %v1331_v33 }
 0x167   : > { %v1358_v35 = vrot.slane %v1240_v47, 4  ;;  %v4964_v11 = vperm.slane %v1381_v23, %v4644_v40 }
 0x168   : > { %v1243_v48 = vpop.xlane.xlu0 %1242 }
 0x169   : > { %v1344_v7 = vrot.slane %v1243_v48, 4  ;;  %v1347_v46 = vsel %vm506_vm1, %v1243_v48, %v1346_v29 }
 0x16a   : > { %v1246_v49 = vpop.xlane.xlu1 %1245 }
 0x16b   : > { %v1356_v19 = vrot.slane %v1246_v49, 4  ;;  %v1345_v31 = vsel %vm506_vm1, %v1344_v7, %v1237_v43  ;;  %v1382_v43 = vrot.slane %v1331_v33, 4  ;;  %v1355_v7 = vperm.slane %v1347_v46, %v4625_v17 }
 0x16c   : > { %v1351_v55 = vperm.slane %v1345_v31, %v4625_v17  ;;  %v1359_v9 = vsel %vm506_vm1, %v1246_v49, %v1358_v35  ;;  %v1371_v46 = vsel %vm506_vm1, %v1339_v2, %v1370_v13 }
 0x16d   : > { %v1357_v42 = vsel %vm506_vm1, %v1356_v19, %v1240_v47  ;;  %v1383_v47 = vsel %vm506_vm1, %v1343_v30, %v1382_v43  ;;  %v1368_v19 = vrot.slane %v1339_v2, 4  ;;  %v1406_v29 = vrot.slane %v1355_v7, 4 }
 0x16e   : > { %v4918_v52 = vpop.xlane.xlu2 %1248  ;;  %v1363_v44 = vperm.slane %v1357_v42, %v4625_v17  ;;  %v1394_v48 = vrot.slane %v1351_v55, 4  ;;  %v1367_v31 = vperm.slane %v1359_v9, %v4625_v17  ;;  %v4956_v42 = vperm.slane %v1383_v47, %v4644_v40 }
 0x16f   : > { %v1369_v33 = vsel %vm506_vm1, %v1368_v19, %v1327_v63  ;;  %v1379_v43 = vperm.slane %v1371_v46, %v4644_v40  ;;  %v1434_v2 = vrot.slane %v4918_v52, 4 }
 0x170   : > { %v4916_v50 = vpop.xlane.xlu0 %1251  ;;  %v1392_v25 = vrot.slane %v1363_v44, 4  ;;  %v1395_v49 = vsel %vm506_vm1, %v1363_v44, %v1394_v48  ;;  %v1404_v9 = vrot.slane %v1367_v31, 4  ;;  %v1407_v27 = vsel %vm506_vm1, %v1367_v31, %v1406_v29 }
 0x171   : > { %v1403_v44 = vperm.slane %v1395_v49, %v4644_v40  ;;  %v1430_v48 = vrot.slane %v4956_v42, 4  ;;  %v1446_v63 = vrot.slane %v4916_v50, 4  ;;  %v4983_v46 = vperm.slane %v1407_v27, %v4644_v40 }
 0x172   : > { %v1393_v13 = vsel %vm506_vm1, %v1392_v25, %v1351_v55  ;;  %v1375_v25 = vperm.slane %v1369_v33, %v4644_v40 }
 0x173   : > { %v1399_v55 = vperm.slane %v1393_v13, %v4644_v40  ;;  %v1420_v33 = vrot.slane %v1403_v44, 4 }
 0x175   : > { %v1421_v51 = vsel %vm506_vm1, %v1420_v33, %v1379_v43 }
 0x178   : > { %v4920_v53 = vpop.xlane.xlu1 %1254 }
 0x179   : > { %v1432_v30 = vrot.slane %v4920_v53, 4  ;;  %v1435_v19 = vsel %vm506_vm1, %v4920_v53, %v1434_v2  ;;  %v1405_v2 = vsel %vm506_vm1, %v1404_v9, %v1355_v7 }
 0x17a   : > { %v4924_v59 = vpop.xlane.xlu2 %1257 }
 0x17b   : > { %v1444_v23 = vrot.slane %v4924_v59, 4  ;;  %v1433_v31 = vsel %vm506_vm1, %v1432_v30, %v4918_v52  ;;  %v1447_v49 = vsel %vm506_vm1, %v4924_v59, %v1446_v63  ;;  %v1443_v52 = vperm.slane %v1435_v19, %v4625_v17 }
 0x17c   : > { %v1439_v59 = vperm.slane %v1433_v31, %v4625_v17  ;;  %v1455_v9 = vperm.slane %v1447_v49, %v4625_v17  ;;  %v1416_v19 = vrot.slane %v1399_v55, 4  ;;  %v1428_v31 = vrot.slane %v4983_v46, 4 }
 0x17d   : > { %v1445_v13 = vsel %vm506_vm1, %v1444_v23, %v4916_v50  ;;  %v1426_v50 = vrot.slane %v4964_v11, 4  ;;  %v1411_v23 = vperm.slane %v1405_v2, %v4644_v40 }
 0x17e   : > { %v4922_v56 = vpop.xlane.xlu0 %1260  ;;  %v1482_v49 = vrot.slane %v1439_v59, 4  ;;  %v1492_v16 = vrot.slane %v1455_v9, 4  ;;  %v1417_v10 = vsel %vm506_vm1, %v1416_v19, %v1375_v25 }
 0x17f   : > { %v1458_v29 = vrot.slane %v4922_v56, 4  ;;  %v1424_v33 = vrot.slane %v1411_v23, 4 }
 0x180   : > { %v4926_v61 = vpop.xlane.xlu1 %1263 }
 0x181   : > { %v1470_v15 = vrot.slane %v4926_v61, 4 }
 0x188   : > { %v1267_v38 = vpop.xlane.xlu2 %1266 }
 0x189   : > { %v1456_v47 = vrot.slane %v1267_v38, 4  ;;  %v1459_v53 = vsel %vm506_vm1, %v1267_v38, %v1458_v29  ;;  %v1422_v29 = vrot.slane %v1379_v43, 4 }
 0x18a   : > { %v4930_v22 = vpop.xlane.xlu0 %1269  ;;  %v1467_v63 = vperm.slane %v1459_v53, %v4625_v17  ;;  %v1494_v53 = vrot.slane %v1443_v52, 4 }
 0x18b   : > { %v1468_v20 = vrot.slane %v4930_v22, 4  ;;  %v1457_v30 = vsel %vm506_vm1, %v1456_v47, %v4922_v56  ;;  %v1471_v38 = vsel %vm506_vm1, %v4930_v22, %v1470_v15  ;;  %v4397_v56 = vmov 0  }
 0x18c   : > { %4096 = vset.pattern.permute.xlu1 %v4397_v56  ;;  %4097 = vset.pattern.permute.xlu2 %v4397_v56  ;;  %v1418_v47 = vrot.slane %v1375_v25, 4  ;;  %v1451_v15 = vperm.slane %v1445_v13, %v4625_v17  ;;  %v1479_v22 = vperm.slane %v1471_v38, %v4625_v17 }
 0x18d   : > { %v4941_v39 = vpop.xlane.xlu1 %1272  ;;  %v1469_v27 = vsel %vm506_vm1, %v1468_v20, %v4926_v61  ;;  %v1463_v20 = vperm.slane %v1457_v30, %v4625_v17  ;;  %4098 = vset.pattern.permute.xlu0 %v4397_v56  ;;  %v1423_v30 = vsel %vm506_vm1, %v1403_v44, %v1422_v29  ;;  %v5025_v44 = vsel %vm506_vm1, %v4983_v46, %v1430_v48 }
 0x18e   : > { %v1475_v61 = vperm.slane %v1469_v27, %v4625_v17  ;;  %v1518_v27 = vrot.slane %v1467_v63, 4  ;;  %v5017_v38 = vmax.f32 %v1417_v10, %v4941_v39  ;;  %v1480_v14 = vrot.slane %v1451_v15, 4 }
 0x18f   : > { %v1506_v56 = vrot.slane %v1463_v20, 4  ;;  %v1516_v43 = vrot.slane %v1479_v22, 4  ;;  %v1483_v25 = vsel %vm506_vm1, %v1451_v15, %v1482_v49  ;;  %v1495_v39 = vsel %vm506_vm1, %v1455_v9, %v1494_v53 }
 0x190   : > { %v1504_v13 = vrot.slane %v1475_v61, 4  ;;  %v1493_v48 = vsel %vm506_vm1, %v1492_v16, %v1443_v52  ;;  %v1562_v46 = vrot.slane %v5017_v38, 4  ;;  %v1481_v15 = vsel %vm506_vm1, %v1480_v14, %v1439_v59 }
 0x191   : > { %v1425_v9 = vsel %vm506_vm1, %v1424_v33, %v4964_v11  ;;  %v1491_v52 = vperm.slane %v1483_v25, %v4644_v40  ;;  %v1429_v33 = vsel %vm506_vm1, %v1428_v31, %v4956_v42 }
 0x192   : > { %v4950_v36 = vpop.xlane.xlu0 %1278 }
 0x193   : > { %v1534_v25 = vrot.slane %v1491_v52, 4 }
 0x195   : > { %v4952_v32 = vpop.xlane.xlu2 %1275 }
 0x197   : > { %v4958_v35 = vpop.xlane.xlu1 %1281 }
 0x19d   : > { %v4990_v26 = vpop.xlane.xlu0 %1296  ;;  %v1285_v8 = vpop.xlane.xlu2 %1284 }
 0x19e   : > { %v5014_v34 = vmax.f32 %v1421_v51, %v1285_v8  ;;  %v1419_v51 = vsel %vm506_vm1, %v1399_v55, %v1418_v47  ;;  %v1427_v8 = vsel %vm506_vm1, %v1411_v23, %v1426_v50  ;;  %v1505_v55 = vsel %vm506_vm1, %v1504_v13, %v1463_v20 }
 0x19f   : > { %v1291_v7 = vpop.xlane.xlu1 %1290  ;;  %v5035_v19 = vmax.f32 %v1419_v51, %v4950_v36  ;;  %v1507_v50 = vsel %vm506_vm1, %v1475_v61, %v1506_v56  ;;  %v1517_v36 = vsel %vm506_vm1, %v1516_v43, %v1467_v63  ;;  %v5052_v20 = vperm.slane %v1493_v48, %v4644_v40 }
 0x1a0   : > { %v5019_v2 = vmax.f32 %v1423_v30, %v1291_v7  ;;  %v1519_v7 = vsel %vm506_vm1, %v1479_v22, %v1518_v27  ;;  %v1560_v29 = vrot.slane %v5014_v34, 4  ;;  %v1503_v22 = vperm.slane %v1495_v39, %v4644_v40 }
 0x1a1   : > { %v1563_v16 = vsel %vm506_vm1, %v5014_v34, %v1562_v46  ;;  %v1527_v23 = vperm.slane %v1519_v7, %v4644_v40  ;;  %v1574_v61 = vrot.slane %v5035_v19, 4  ;;  %v1511_v14 = vperm.slane %v1505_v55, %v4644_v40 }
 0x1a2   : > { %v1572_v47 = vrot.slane %v5019_v2, 4  ;;  %v1561_v11 = vsel %vm506_vm1, %v1560_v29, %v5017_v38  ;;  %v1515_v59 = vperm.slane %v1507_v50, %v4644_v40  ;;  %v1487_v63 = vperm.slane %v1481_v15, %v4644_v40 }
 0x1a3   : > { %v5062_v49 = vmax.f32 %v1425_v9, %v4990_v26  ;;  %v5067_v30 = vperm.slane %v1517_v36, %v4644_v40  ;;  %v1571_v13 = vperm.slane %v1563_v16, %v4625_v17  ;;  %v1575_v43 = vsel %vm506_vm1, %v5019_v2, %v1574_v61 }
 0x1a4   : > { %v1573_v53 = vsel %vm506_vm1, %v1572_v47, %v5035_v19  ;;  %v1542_v51 = vrot.slane %v1503_v22, 4  ;;  %v1567_v26 = vperm.slane %v1561_v11, %v4625_v17  ;;  %v1540_v29 = vrot.slane %v1527_v23, 4 }
 0x1a5   : > { %v1303_v41 = vpop.xlane.xlu2 %1302  ;;  %v5021_v3 = vpop.xlane.xlu0 %1287  ;;  %v1528_v48 = vrot.slane %v1511_v14, 4  ;;  %v1579_v46 = vperm.slane %v1573_v53, %v4625_v17  ;;  %v1532_v55 = vrot.slane %v1515_v59, 4  ;;  %v1530_v50 = vrot.slane %v1487_v63, 4 }
 0x1a6   : > { %v1586_v15 = vrot.slane %v5062_v49, 4  ;;  %v1583_v9 = vperm.slane %v1575_v43, %v4625_v17  ;;  %v1536_v42 = vrot.slane %v5067_v30, 4  ;;  %v1622_v31 = vrot.slane %v1571_v13, 4 }
 0x1a7   : > { %v5030_v10 = vpop.xlane.xlu1 %1299  ;;  %v5084_v36 = vmax.f32 %v1427_v8, %v1303_v41  ;;  %v1543_v61 = vsel %vm506_vm1, %v1527_v23, %v1542_v51  ;;  %v1610_v11 = vrot.slane %v1567_v26, 4  ;;  %v1535_v53 = vsel %vm506_vm1, %v1515_v59, %v1534_v25 }
 0x1a8   : > { %v1529_v39 = vsel %vm506_vm1, %v1528_v48, %v1487_v63  ;;  %v1608_v43 = vrot.slane %v1579_v46, 4  ;;  %v1533_v45 = vsel %vm506_vm1, %v1532_v55, %v1491_v52  ;;  %v1531_v8 = vsel %vm506_vm1, %v1511_v14, %v1530_v50 }
 0x1a9   : > { %v1620_v24 = vrot.slane %v1583_v9, 4  ;;  %v5098_v23 = vmax.f32 %v1533_v45, %v5021_v3  ;;  %v1537_v59 = vsel %vm506_vm1, %v1536_v42, %v5052_v20  ;;  %v5109_v14 = vmax.f32 %v1529_v39, %v4952_v32 }
 0x1aa   : > { %v1611_v48 = vsel %vm506_vm1, %v1579_v46, %v1610_v11  ;;  %v5116_v55 = vmax.f32 %v1531_v8, %v4958_v35 }
 0x1ab   : > { %v5131_v11 = vperm.slane %v1611_v48, %v4644_v40 }
 0x1ad   : > { %v1294_v27 = vpop.xlane.xlu2 %1293  ;;  %v5069_v56 = vpop.xlane.xlu0 %1305 }
 0x1ae   : > { %v5126_v46 = vmax.f32 %v1535_v53, %v1294_v27 }
 0x1af   : > { %v1309_v7 = vpop.xlane.xlu1 %1308 }
 0x1b0   : > { %v5079_v47 = vmax.f32 %v1429_v33, %v1309_v7  ;;  %v1541_v7 = vsel %vm506_vm1, %v1540_v29, %v1503_v22  ;;  %v1598_v22 = vrot.slane %v5084_v36, 4  ;;  %v1623_v29 = vsel %vm506_vm1, %v1583_v9, %v1622_v31 }
 0x1b1   : > { %v1672_v9 = vrot.slane %v5098_v23, 4  ;;  %v1631_v42 = vperm.slane %v1623_v29, %v4644_v40  ;;  %v1621_v31 = vsel %vm506_vm1, %v1620_v24, %v1571_v13  ;;  %v1684_v29 = vrot.slane %v5126_v46, 4 }
 0x1b2   : > { %v1584_v16 = vrot.slane %v5079_v47, 4  ;;  %v1587_v33 = vsel %vm506_vm1, %v5079_v47, %v1586_v15  ;;  %v1609_v15 = vsel %vm506_vm1, %v1608_v43, %v1567_v26 }
 0x1b3   : > { %v1595_v63 = vperm.slane %v1587_v33, %v4625_v17  ;;  %v5136_v43 = vperm.slane %v1609_v15, %v4644_v40  ;;  %v1670_v8 = vrot.slane %v1631_v42, 4 }
 0x1b4   : > { %v1585_v41 = vsel %vm506_vm1, %v1584_v16, %v5062_v49 }
 0x1b5   : > { %v1315_v51 = vpop.xlane.xlu0 %1314  ;;  %v1312_v25 = vpop.xlane.xlu2 %1311  ;;  %v1591_v45 = vperm.slane %v1585_v41, %v4625_v17  ;;  %v1646_v35 = vrot.slane %v1595_v63, 4  ;;  %v5139_v41 = vmax.f32 %v1537_v59, %v5030_v10  ;;  %v1662_v10 = vrot.slane %v5131_v11, 4 }
 0x1b6   : > { %v5105_v52 = vmax.f32 %v5025_v44, %v1315_v51  ;;  %v5112_v3 = vmax.f32 %v1541_v7, %v1312_v25 }
 0x1b7   : > { %v1318_v39 = vpop.xlane.xlu1 %1317  ;;  %v1634_v7 = vrot.slane %v1591_v45, 4 }
 0x1b8   : > { %v1596_v50 = vrot.slane %v5105_v52, 4  ;;  %v1599_v44 = vsel %vm506_vm1, %v5105_v52, %v1598_v22  ;;  %v1696_v33 = vrot.slane %v5112_v3, 4  ;;  %v5141_v27 = vmax.f32 %v1543_v61, %v1318_v39 }
 0x1b9   : > { %v1607_v32 = vperm.slane %v1599_v44, %v4625_v17  ;;  %v1673_v22 = vsel %vm506_vm1, %v1672_v9, %v5109_v14  ;;  %v1658_v44 = vrot.slane %v5136_v43, 4 }
 0x1ba   : > { %v1597_v16 = vsel %vm506_vm1, %v1596_v50, %v5084_v36  ;;  %v1697_v61 = vsel %vm506_vm1, %v1696_v33, %v5139_v41  ;;  %v1708_v15 = vrot.slane %v5141_v27, 4  ;;  %v1679_v33 = vperm.slane %v1673_v22, %v4625_v17 }
 0x1bb   : > { %v1603_v26 = vperm.slane %v1597_v16, %v4625_v17  ;;  %v1644_v24 = vrot.slane %v1607_v32, 4  ;;  %v1647_v13 = vsel %vm506_vm1, %v1607_v32, %v1646_v35  ;;  %v1698_v35 = vrot.slane %v5139_v41, 4 }
 0x1bc   : > { %v1655_v53 = vperm.slane %v1647_v13, %v4644_v40  ;;  %v5947_v16 = vrot.slane %v5052_v20, 4 }
 0x1bd   : > { %v1635_v51 = vsel %vm506_vm1, %v1603_v26, %v1634_v7  ;;  %v1632_v25 = vrot.slane %v1603_v26, 4  ;;  %v1645_v39 = vsel %vm506_vm1, %v1644_v24, %v1595_v63  ;;  %v1685_v7 = vsel %vm506_vm1, %v1684_v29, %v5116_v55 }
 0x1be   : > { %v1643_v48 = vperm.slane %v1635_v51, %v4644_v40  ;;  %v1671_v59 = vsel %vm506_vm1, %v1655_v53, %v1670_v8  ;;  %v1539_v26 = vsel %vm506_vm1, %v5067_v30, %v5947_v16  ;;  %v1703_v24 = vperm.slane %v1697_v61, %v4625_v17 }
 0x1bf   : > { %v1633_v50 = vsel %vm506_vm1, %v1632_v25, %v1591_v45  ;;  %1821 = vperm.xlu1 %4096, %v1671_v59   ;;  %v1627_v45 = vperm.slane %v1621_v31, %v4644_v40  ;;  %v5172_v13 = vmax.f32 %v1539_v26, %v5069_v56  ;;  %v1651_v20 = vperm.slane %v1645_v39, %v4644_v40 }
 0x1c0   : > { %v1663_v9 = vsel %vm506_vm1, %v1643_v48, %v1662_v10  ;;  %v5159_v32 = vperm.slane %v1633_v50, %v4644_v40  ;;  %v1699_v30 = vsel %vm506_vm1, %v5112_v3, %v1698_v35  ;;  %v1668_v8 = vrot.slane %v1655_v53, 4 }
 0x1c1   : > { %1801 = vperm.xlu2 %4097, %v1663_v9   ;;  %v1709_v31 = vsel %vm506_vm1, %v1708_v15, %v5172_v13  ;;  %v1691_v51 = vperm.slane %v1685_v7, %v4625_v17  ;;  %v1666_v25 = vrot.slane %v1627_v45, 4  ;;  %v1722_v56 = vrot.slane %v1679_v33, 4 }
 0x1c2   : > { %v1659_v63 = vsel %vm506_vm1, %v5159_v32, %v1658_v44  ;;  %v1710_v22 = vrot.slane %v5172_v13, 4  ;;  %v1707_v29 = vperm.slane %v1699_v30, %v4625_v17  ;;  %v1715_v10 = vperm.slane %v1709_v31, %v4625_v17 }
 0x1c3   : > { %1791 = vperm.xlu0 %4098, %v1659_v63   ;;  %v1667_v61 = vsel %vm506_vm1, %v1651_v20, %v1666_v25  ;;  %v1746_v59 = vrot.slane %v1703_v24, 4  ;;  %v1669_v44 = vsel %vm506_vm1, %v1668_v8, %v1631_v42  ;;  %v1723_v53 = vsel %vm506_vm1, %v1691_v51, %v1722_v56 }
 0x1c4   : > { %v1711_v50 = vsel %vm506_vm1, %v5141_v27, %v1710_v22  ;;  %v1674_v15 = vrot.slane %v5109_v14, 4  ;;  %v1758_v9 = vrot.slane %v1707_v29, 4  ;;  %v1660_v35 = vrot.slane %v1643_v48, 4 }
 0x1c5   : > { %v1719_v39 = vperm.slane %v1711_v50, %v4625_v17  ;;  %v1747_v16 = vsel %vm506_vm1, %v1715_v10, %v1746_v59  ;;  %v1686_v26 = vrot.slane %v5116_v55, 4  ;;  %v1731_v42 = vperm.slane %v1723_v53, %v4644_v40 }
 0x1c6   : > { %v1675_v7 = vsel %vm506_vm1, %v5098_v23, %v1674_v15  ;;  %v1755_v30 = vperm.slane %v1747_v16, %v4644_v40  ;;  %v1744_v59 = vrot.slane %v1715_v10, 4  ;;  %v1664_v50 = vrot.slane %v1651_v20, 4 }
 0x1c7   : > { %1811 = vperm.xlu1 %4096, %v1667_v61   ;;  %v1687_v63 = vsel %vm506_vm1, %v5126_v46, %v1686_v26  ;;  %v1683_v31 = vperm.slane %v1675_v7, %v4625_v17  ;;  %v1759_v48 = vsel %vm506_vm1, %v1719_v39, %v1758_v9  ;;  %v1774_v8 = vrot.slane %v1731_v42, 4 }
 0x1c8   : > { %v1695_v25 = vperm.slane %v1687_v63, %v4625_v17  ;;  %v1767_v22 = vperm.slane %v1759_v48, %v4644_v40  ;;  %v1665_v15 = vsel %vm506_vm1, %v1664_v50, %v1627_v45  ;;  %v1756_v20 = vrot.slane %v1719_v39, 4 }
 0x1c9   : > { %1816 = vperm.xlu2 %4097, %v1669_v44   ;;  %v1775_v56 = vsel %vm506_vm1, %v1755_v30, %v1774_v8  ;;  %v1734_v61 = vrot.slane %v1683_v31, 4  ;;  %v1656_v26 = vrot.slane %v5159_v32, 4 }
 0x1ca   : > { %v1780_v53 = vrot.slane %v1767_v22, 4  ;;  %v1757_v63 = vsel %vm506_vm1, %v1756_v20, %v1707_v29 }
 0x1cb   : > { %1967 = vperm.xlu0 %4098, %v5109_v14   ;;  %v1661_v14 = vsel %vm506_vm1, %v1660_v35, %v5131_v11  ;;  %v1735_v44 = vsel %vm506_vm1, %v1695_v25, %v1734_v61  ;;  %v1745_v11 = vsel %vm506_vm1, %v1744_v59, %v1703_v24  ;;  %v1732_v35 = vrot.slane %v1695_v25, 4 }
 0x1cc   : > { %v1743_v9 = vperm.slane %v1735_v44, %v4644_v40  ;;  %v1751_v10 = vperm.slane %v1745_v11, %v4644_v40  ;;  %v1657_v45 = vsel %vm506_vm1, %v1656_v26, %v5136_v43  ;;  %v1763_v32 = vperm.slane %v1757_v63, %v4644_v40  ;;  %v3974_v11 = vld [vmem:[%s5246_s4 + $0x10] sm:$0xff] }
 0x1cd   : > { %v1772_v43 = vrot.slane %v1755_v30, 4  ;;  %v3972_v30 = vld [vmem:[%s5246_s4] sm:$0xff]  ;;  %2596 = vmatpush.bf16.msra.mxu2 %v3974_v11 }
 0x1ce   : > { %v1781_v16 = vsel %vm506_vm1, %v1780_v53, %v1743_v9  ;;  %v1768_v24 = vrot.slane %v1751_v10, 4  ;;  %v1782_v48 = vrot.slane %v1743_v9, 4  ;;  %2552 = vmatpush.bf16.msra.mxu0 %v3972_v30  ;;  %v3987_v30 = vld [vmem:[%s5246_s4 + $0x78] sm:$0xff] }
 0x1cf   : > { %1796 = vperm.xlu1 %4096, %v1661_v14   ;;  %v1773_v8 = vsel %vm506_vm1, %v1772_v43, %v1731_v42 }
 0x1d1   : > { %1972 = vperm.xlu2 %4097, %v5035_v19   ;;  %v1720_v19 = vrot.slane %v1691_v51, 4 }
 0x1d3   : > { %1841 = vperm.xlu0 %4098, %v1775_v56   ;;  %v1721_v7 = vsel %vm506_vm1, %v1720_v19, %v1679_v33  ;;  %v1776_v56 = vrot.slane %v1763_v32, 4 }
 0x1d4   : > { %v1727_v51 = vperm.slane %v1721_v7, %v4644_v40 }
 0x1d6   : > { %v1769_v39 = vsel %vm506_vm1, %v1768_v24, %v1727_v51  ;;  %v1770_v29 = vrot.slane %v1727_v51, 4 }
 0x1d7   : > { %1962 = vperm.xlu1 %4096, %v5017_v38   ;;  %v1733_v38 = vsel %vm506_vm1, %v1732_v35, %v1683_v31 }
 0x1d8   : > { %v1739_v14 = vperm.slane %v1733_v38, %v4644_v40  ;;  %v1771_v25 = vsel %vm506_vm1, %v1751_v10, %v1770_v29  ;;  %v3983_v10 = vld [vmem:[%s5246_s4 + $0x58] sm:$0xff] }
 0x1d9   : > { %1806 = vperm.xlu2 %4097, %v1665_v15  }
 0x1da   : > { %v1778_v33 = vrot.slane %v1739_v14, 4  ;;  %v1777_v61 = vsel %vm506_vm1, %v1776_v56, %v1739_v14 }
 0x1db   : > { %1856 = vperm.xlu0 %4098, %v1781_v16   ;;  %v3977_v16 = vld [vmem:[%s5246_s4 + $0x28] sm:$0xff] }
 0x1dc   : > { %v1779_v31 = vsel %vm506_vm1, %v1763_v32, %v1778_v33  ;;  %v3976_v33 = vld [vmem:[%s5246_s4 + $0x20] sm:$0xff] }
 0x1dd   : > { %2640 = vmatpush.bf16.msrb.mxu0 %v3976_v33 }
 0x1df   : > { %1977 = vperm.xlu1 %4096, %v5116_v55   ;;  %v1783_v55 = vsel %vm506_vm1, %v1767_v22, %v1782_v48 }
 0x1e1   : > { %1786 = vperm.xlu2 %4097, %v1657_v45  }
 0x1e3   : > { %1826 = vperm.xlu0 %4098, %v1769_v39  }
 0x1e7   : > { %1851 = vperm.xlu1 %4096, %v1779_v31  }
 0x1e9   : > { %1861 = vperm.xlu2 %4097, %v1783_v55  }
 0x1eb   : > { %1982 = vperm.xlu0 %4098, %v5014_v34   ;;  %v3975_v34 = vld [vmem:[%s5246_s4 + $0x18] sm:$0xff] }
 0x1ec   : > { %2618 = vmatpush.bf16.msra.mxu3 %v3975_v34 }
 0x1ef   : > { %1836 = vperm.xlu1 %4096, %v1773_v8  }
 0x1f1   : > { %1831 = vperm.xlu2 %4097, %v1771_v25  }
 0x1f3   : > { %1997 = vperm.xlu0 %4098, %v5126_v46   ;;  %v3979_v46 = vld [vmem:[%s5246_s4 + $0x38] sm:$0xff] }
 0x1f4   : > { %2706 = vmatpush.bf16.msrb.mxu3 %v3979_v46 }
 0x1f7   : > { %1992 = vperm.xlu1 %4096, %v5019_v2  }
 0x1f9   : > { %1846 = vperm.xlu2 %4097, %v1777_v61  }
 0x1fb   : > { %2012 = vperm.xlu0 %4098, %v5084_v36  }
 0x1ff   : > { %2007 = vperm.xlu1 %4096, %v5139_v41   ;;  %v3973_v41 = vld [vmem:[%s5246_s4 + $0x8] sm:$0xff] }
 0x200   : > { %2574 = vmatpush.bf16.msra.mxu1 %v3973_v41 }
 0x201   : > { %1987 = vperm.xlu2 %4097, %v5098_v23  }
 0x203   : > { %2027 = vperm.xlu0 %4098, %v5112_v3  }
 0x204   : > { %2662 = vmatpush.bf16.msrb.mxu1 %v3977_v16 }
 0x207   : > { %2022 = vperm.xlu1 %4096, %v5079_v47  }
 0x209   : > { %2002 = vperm.xlu2 %4097, %v5062_v49  }
 0x20f   : > { %2037 = vperm.xlu1 %4096, %v5141_v27  }
 0x211   : > { %2017 = vperm.xlu2 %4097, %v5172_v13  }
 0x219   : > { %2032 = vperm.xlu2 %4097, %v5105_v52  }
 0x21b   : > { %v1802_v2 = vpop.permute.xlu2 %1801 }
 0x21c   : > { %v1867_v47 = vsub.f32 %v4776_v5, %v1802_v2 }
 0x21e   : > { %v1883_v49 = vpack.c.bf16 %v1867_v47, %v1867_v47 }
 0x220   : > { %v1899_v36 = vunpack.c.l.bf16 %v1883_v49  ;;  %v3978_v49 = vld [vmem:[%s5246_s4 + $0x30] sm:$0xff] }
 0x221   : > { %2684 = vmatpush.bf16.msrb.mxu2 %v3978_v49  ;;  %v3985_v49 = vld [vmem:[%s5246_s4 + $0x68] sm:$0xff] }
 0x222   : > { %v1918_v23 = vmul.f32 1.442695, %v1899_v36 }
 0x223   : > { %v5253_v3 = vpop.permute.xlu2 %1816 }
 0x224   : > { %4099 = vpow2.f32 %v1918_v23 }
 0x22a   : > { %v4100_v27 = vpop.eup %4099 }
 0x22b   : > { %v5257_v42 = vpack.c.bf16 %v4100_v27, %v4100_v27  ;;  %v1973_v13 = vpop.permute.xlu2 %1972  ;;  %v1870_v27 = vsub.f32 %v4794_v18, %v5253_v3 }
 0x22c   : > { %v2042_v52 = vsub.f32 %v4856_v62, %v1973_v13 }
 0x22d   : > { %3853 = vmatmul.msk.bf16.vlgmr.msra.gmra.mxu3 %vm1222_vm4, %v5257_v42 }
 0x22e   : > { %v2058_v5 = vpack.c.bf16 %v2042_v52, %v2042_v52  ;;  %2794 = vmatpush.bf16.msra.mxu3 %v3983_v10 }
 0x230   : > { %v2074_v22 = vunpack.c.l.bf16 %v2058_v5  ;;  %v3981_v5 = vld [vmem:[%s5246_s4 + $0x48] sm:$0xff] }
 0x231   : > { %v1822_v50 = vpop.permute.xlu1 %1821 }
 0x232   : > { %v2092_v59 = vmul.f32 1.442695, %v2074_v22  ;;  %v1871_v44 = vsub.f32 %v4800_v21, %v1822_v50 }
 0x233   : > { %v1807_v53 = vpop.permute.xlu2 %1806 }
 0x234   : > { %4101 = vpow2.f32 %v2092_v59  ;;  %v1887_v15 = vpack.c.bf16 %v1871_v44, %v1871_v44 }
 0x235   : > { %v1792_v9 = vpop.permute.xlu0 %1791 }
 0x236   : > { %v1865_v62 = vsub.f32 %v4764_v60, %v1792_v9  ;;  %v1903_v19 = vunpack.c.l.bf16 %v1887_v15  ;;  %v1886_v9 = vpack.c.bf16 %v1870_v27, %v1870_v27 }
 0x238   : > { %v1881_v35 = vpack.c.bf16 %v1865_v62, %v1865_v62  ;;  %v1926_v20 = vmul.f32 1.442695, %v1903_v19 }
 0x239   : > { %v1812_v24 = vpop.permute.xlu1 %1811 }
 0x23a   : > { %v4102_v26 = vpop.eup %4101  ;;  %v1897_v7 = vunpack.c.l.bf16 %v1881_v35  ;;  %4103 = vpow2.f32 %v1926_v20  ;;  %v1869_v51 = vsub.f32 %v4788_v12, %v1812_v24  ;;  %v1902_v24 = vunpack.c.l.bf16 %v1886_v9 }
 0x23b   : > { %v5268_v21 = vpack.c.bf16 %v4102_v26, %v4102_v26  ;;  %v1787_v38 = vpop.permute.xlu2 %1786  ;;  %v3980_v26 = vld [vmem:[%s5246_s4 + $0x40] sm:$0xff] }
 0x23c   : > { %v1914_v45 = vmul.f32 1.442695, %v1897_v7  ;;  %v1864_v60 = vsub.f32 %v4758_v57, %v1787_v38  ;;  %v1885_v48 = vpack.c.bf16 %v1869_v51, %v1869_v51  ;;  %v1868_v57 = vsub.f32 %v4780_v6, %v1807_v53 }
 0x23d   : > { %v1968_v63 = vpop.permute.xlu0 %1967  ;;  %v2202_v14 = vunpack.c.l.bf16 %v5268_v21 }
 0x23e   : > { %4105 = vpow2.f32 %v1914_v45  ;;  %v1880_v39 = vpack.c.bf16 %v1864_v60, %v1864_v60  ;;  %v2041_v32 = vsub.f32 %v4860_v0, %v1968_v63  ;;  %v1901_v2 = vunpack.c.l.bf16 %v1885_v48 }
 0x23f   : > { %v2222_v29 = vsel %vm1222_vm4, %v2202_v14, 0.0  ;;  %v1884_v46 = vpack.c.bf16 %v1868_v57, %v1868_v57 }
 0x240   : > { %v1896_v31 = vunpack.c.l.bf16 %v1880_v39  ;;  %v2057_v55 = vpack.c.bf16 %v2041_v32, %v2041_v32  ;;  %v4104_v43 = vpop.eup %4103  ;;  %v1922_v13 = vmul.f32 1.442695, %v1901_v2 }
 0x241   : > { %v5276_v8 = vpack.c.bf16 %v4104_v43, %v4104_v43  ;;  %v1797_v56 = vpop.permute.xlu1 %1796  ;;  %v1900_v50 = vunpack.c.l.bf16 %v1884_v46  ;;  %v3982_v43 = vld [vmem:[%s5246_s4 + $0x50] sm:$0xff] }
 0x242   : > { %v1912_v12 = vmul.f32 1.442695, %v1896_v31  ;;  %v2073_v25 = vunpack.c.l.bf16 %v2057_v55  ;;  %2223 = vadd.xlane.f32.xlu2 %v2222_v29  ;;  %v1866_v61 = vsub.f32 %v4770_v1, %v1797_v56  ;;  %v1924_v31 = vmul.f32 1.442695, %v1902_v24 }
 0x243   : > { %v1862_v0 = vpop.permute.xlu2 %1861  ;;  %3873 = vmatmul.msk.bf16.vlgmr.msrb.gmra.mxu3 %vm1222_vm4, %v5276_v8  ;;  %v1920_v10 = vmul.f32 1.442695, %v1900_v50 }
 0x244   : > { %v4106_v34 = vpop.eup %4105  ;;  %4107 = vpow2.f32 %v1912_v12  ;;  %v2090_v47 = vmul.f32 1.442695, %v2073_v25  ;;  %v1882_v6 = vpack.c.bf16 %v1866_v61, %v1866_v61  ;;  %v1879_v44 = vsub.f32 %v4848_v54, %v1862_v0  ;;  %2882 = vmatpush.bf16.msrb.mxu3 %v3987_v30  ;;  %v5949_v61 = vld [vmem:[#allocation20_spill] sm:$0xff] }
 0x245   : > { %v5283_v36 = vpack.c.bf16 %v4106_v34, %v4106_v34  ;;  %v1842_v23 = vpop.permute.xlu0 %1841  ;;  %v5951_v30 = vld [vmem:[#allocation28_spill] sm:$0xff] }
 0x246   : > { %4109 = vpow2.f32 %v2090_v47  ;;  %v1875_v41 = vsub.f32 %v4824_v37, %v1842_v23  ;;  %v1898_v1 = vunpack.c.l.bf16 %v1882_v6  ;;  %v1895_v20 = vpack.c.bf16 %v1879_v44, %v1879_v44 }
 0x247   : > { %3843 = vmatmul.msk.bf16.vlgmr.msra.gmra.mxu1 %vm1222_vm4, %v5283_v36 }
 0x248   : > { %v1891_v52 = vpack.c.bf16 %v1875_v41, %v1875_v41  ;;  %v1916_v22 = vmul.f32 1.442695, %v1898_v1  ;;  %2750 = vmatpush.bf16.msra.mxu1 %v3981_v5  ;;  %v1911_v14 = vunpack.c.l.bf16 %v1895_v20  ;;  %v3991_v20 = vld [vmem:[%s4584_s18 + $0x18] sm:$0xff] }
 0x249   : > { %v1963_v11 = vpop.permute.xlu1 %1962 }
 0x24a   : > { %v4108_v59 = vpop.eup %4107  ;;  %v1907_v53 = vunpack.c.l.bf16 %v1891_v52  ;;  %4111 = vpow2.f32 %v1916_v22  ;;  %v2040_v15 = vsub.f32 %v4852_v58, %v1963_v11  ;;  %v1942_v56 = vmul.f32 1.442695, %v1911_v14 }
 0x24b   : > { %v5293_v37 = vpack.c.bf16 %v4108_v59, %v4108_v59  ;;  %v1832_v18 = vpop.permute.xlu2 %1831  ;;  %4113 = vpow2.f32 %v1922_v13  ;;  %v5950_v13 = vld [vmem:[#allocation23_spill] sm:$0xff] }
 0x24c   : > { %v4110_v3 = vpop.eup %4109  ;;  %v1934_v62 = vmul.f32 1.442695, %v1907_v53  ;;  %v1873_v19 = vsub.f32 %v4812_v28, %v1832_v18  ;;  %v2056_v54 = vpack.c.bf16 %v2040_v15, %v2040_v15  ;;  %v5952_v15 = vld [vmem:[#allocation25_spill] sm:$0xff] }
 0x24d   : > { %v5297_v35 = vpack.c.bf16 %v4110_v3, %v4110_v3  ;;  %v5299_v16 = vpop.permute.xlu0 %1856  ;;  %3838 = vmatmul.msk.bf16.vlgmr.msra.gmra.mxu0 %vm1222_vm4, %v5293_v37  ;;  %v3984_v3 = vld [vmem:[%s5246_s4 + $0x60] sm:$0xff] }
 0x24e   : > { %4115 = vpow2.f32 %v1934_v62  ;;  %v2072_v58 = vunpack.c.l.bf16 %v2056_v54  ;;  %v1889_v38 = vpack.c.bf16 %v1873_v19, %v1873_v19  ;;  %2728 = vmatpush.bf16.msra.mxu0 %v3980_v26  ;;  %v5953_v19 = vld [vmem:[#allocation22_spill] sm:$0xff] }
 0x24f   : > { %v2201_v7 = vunpack.c.l.bf16 %v5297_v35  ;;  %4117 = vpow2.f32 %v1920_v10 }
 0x250   : > { %v4112_v45 = vpop.eup %4111  ;;  %v2088_v28 = vmul.f32 1.442695, %v2072_v58  ;;  %v1905_v55 = vunpack.c.l.bf16 %v1889_v38 }
 0x251   : > { %v2219_v51 = vsel %vm1222_vm4, %v2201_v7, 0.0  ;;  %v4114_v60 = vpop.eup %4113  ;;  %v5306_v63 = vpack.c.bf16 %v4112_v45, %v4112_v45  ;;  %v1978_v39 = vpop.permute.xlu1 %1977 }
 0x252   : > { %2220 = vadd.xlane.f32.xlu1 %v2219_v51  ;;  %4119 = vpow2.f32 %v2088_v28  ;;  %v2043_v32 = vsub.f32 %v4866_v4, %v1978_v39  ;;  %v5312_v29 = vpack.c.bf16 %v4114_v60, %v4114_v60  ;;  %v1930_v2 = vmul.f32 1.442695, %v1905_v55  ;;  %v5954_v60 = vld [vmem:[#allocation21_spill] sm:$0xff] }
 0x253   : > { %v1847_v33 = vpop.permute.xlu2 %1846  ;;  %3848 = vmatmul.msk.bf16.vlgmr.msra.gmra.mxu2 %vm1222_vm4, %v5306_v63  ;;  %4121 = vpow2.f32 %v1924_v31  ;;  %v5955_v31 = vld [vmem:[#allocation27_spill] sm:$0xff] }
 0x254   : > { %v4116_v48 = vpop.eup %4115  ;;  %v2059_v12 = vpack.c.bf16 %v2043_v32, %v2043_v32  ;;  %2772 = vmatpush.bf16.msra.mxu2 %v3982_v43  ;;  %4123 = vpow2.f32 %v1942_v56  ;;  %v1876_v54 = vsub.f32 %v5953_v19, %v1847_v33  ;;  %v3986_v43 = vld [vmem:[%s5246_s4 + $0x70] sm:$0xff]  ;;  %v5959_v19 = vld [vmem:[#allocation33_spill] sm:$0xff] }
 0x255   : > { %v5314_v57 = vpack.c.bf16 %v4116_v48, %v4116_v48  ;;  %v1827_v25 = vpop.permute.xlu0 %1826  ;;  %v4118_v34 = vpop.eup %4117 }
 0x256   : > { %v1872_v0 = vsub.f32 %v5949_v61, %v1827_v25  ;;  %v2075_v4 = vunpack.c.l.bf16 %v2059_v12  ;;  %v5324_v27 = vpack.c.bf16 %v4118_v34, %v4118_v34  ;;  %v1892_v33 = vpack.c.bf16 %v1876_v54, %v1876_v54 }
 0x257   : > { %3863 = vmatmul.msk.bf16.vlgmr.msrb.gmra.mxu1 %vm1222_vm4, %v5312_v29  ;;  %3893 = vmatmul.msk.bf16.vlgmr.msra.gmra.mxu3 %vm1222_vm4, %v5314_v57 }
 0x258   : > { %v1888_v47 = vpack.c.bf16 %v1872_v0, %v1872_v0  ;;  %v4120_v6 = vpop.eup %4119  ;;  %v2094_v23 = vmul.f32 1.442695, %v2075_v4  ;;  %2838 = vmatpush.bf16.msrb.mxu1 %v3985_v49  ;;  %3233 = vmatpush.bf16.msra.mxu3 %v3991_v20 }
 0x259   : > { %v5322_v46 = vpack.c.bf16 %v4120_v6, %v4120_v6  ;;  %v1852_v1 = vpop.permute.xlu1 %1851  ;;  %v4122_v44 = vpop.eup %4121 }
 0x25a   : > { %v1904_v41 = vunpack.c.l.bf16 %v1888_v47  ;;  %4125 = vpow2.f32 %v2094_v23  ;;  %v1877_v52 = vsub.f32 %v5950_v13, %v1852_v1  ;;  %v4124_v62 = vpop.eup %4123  ;;  %v5336_v58 = vpack.c.bf16 %v4122_v44, %v4122_v44 }
 0x25b   : > { %v1988_v5 = vpop.permute.xlu2 %1987  ;;  %4127 = vpow2.f32 %v1930_v2  ;;  %v2200_v50 = vunpack.c.l.bf16 %v5322_v46  ;;  %v5341_v32 = vpack.c.bf16 %v4124_v62, %v4124_v62  ;;  %v5956_v2 = vld [vmem:[#allocation30_spill] sm:$0xff] }
 0x25c   : > { %v2045_v22 = vsub.f32 %v5951_v30, %v1988_v5  ;;  %v1928_v53 = vmul.f32 1.442695, %v1904_v41  ;;  %v1893_v11 = vpack.c.bf16 %v1877_v52, %v1877_v52  ;;  %v5957_v41 = vld [vmem:[#allocation24_spill] sm:$0xff]  ;;  %v3989_v5 = vld [vmem:[%s4584_s18 + $0x8] sm:$0xff]  ;;  %v1908_v30 = vunpack.c.l.bf16 %v1892_v33 }
 0x25d   : > { %v1983_v59 = vpop.permute.xlu0 %1982  ;;  %3858 = vmatmul.msk.bf16.vlgmr.msrb.gmra.mxu0 %vm1222_vm4, %v5324_v27  ;;  %v2216_v9 = vsel %vm1222_vm4, %v2200_v50, 0.0  ;;  %v1878_v1 = vsub.f32 %v5957_v41, %v5299_v16 }
 0x25e   : > { %v2044_v18 = vsub.f32 %v5952_v15, %v1983_v59  ;;  %2217 = vadd.xlane.f32.xlu0 %v2216_v9  ;;  %2816 = vmatpush.bf16.msrb.mxu0 %v3984_v3  ;;  %v2061_v7 = vpack.c.bf16 %v2045_v22, %v2045_v22  ;;  %4129 = vpow2.f32 %v1928_v53  ;;  %v1909_v45 = vunpack.c.l.bf16 %v1893_v11  ;;  %v5958_v15 = vld [vmem:[#allocation26_spill] sm:$0xff] }
 0x25f   : > { %v1894_v9 = vpack.c.bf16 %v1878_v1, %v1878_v1 }
 0x260   : > { %v2060_v10 = vpack.c.bf16 %v2044_v18, %v2044_v18  ;;  %v4126_v26 = vpop.eup %4125  ;;  %v2077_v25 = vunpack.c.l.bf16 %v2061_v7  ;;  %v1938_v4 = vmul.f32 1.442695, %v1909_v45  ;;  %v1936_v7 = vmul.f32 1.442695, %v1908_v30  ;;  %v5960_v45 = vld [vmem:[#allocation29_spill] sm:$0xff] }
 0x261   : > { %v4128_v24 = vpop.eup %4127  ;;  %v5338_v38 = vpack.c.bf16 %v4126_v26, %v4126_v26  ;;  %v1837_v51 = vpop.permute.xlu1 %1836  ;;  %v1910_v33 = vunpack.c.l.bf16 %v1894_v9 }
 0x262   : > { %v2076_v28 = vunpack.c.l.bf16 %v2060_v10  ;;  %v1874_v14 = vsub.f32 %v5954_v60, %v1837_v51  ;;  %v5347_v12 = vpack.c.bf16 %v4128_v24, %v4128_v24  ;;  %v2098_v59 = vmul.f32 1.442695, %v2077_v25  ;;  %v3988_v51 = vld [vmem:[%s4584_s18] sm:$0xff] }
 0x263   : > { %v2003_v39 = vpop.permute.xlu2 %2002  ;;  %3868 = vmatmul.msk.bf16.vlgmr.msrb.gmra.mxu2 %vm1222_vm4, %v5336_v58  ;;  %v2203_v0 = vunpack.c.l.bf16 %v5338_v38  ;;  %v1940_v41 = vmul.f32 1.442695, %v1910_v33 }
 0x264   : > { %v2096_v48 = vmul.f32 1.442695, %v2076_v28  ;;  %v2048_v55 = vsub.f32 %v5955_v31, %v2003_v39  ;;  %v1890_v56 = vpack.c.bf16 %v1874_v14, %v1874_v14  ;;  %2860 = vmatpush.bf16.msrb.mxu2 %v3986_v43  ;;  %v4130_v23 = vpop.eup %4129 }
 0x265   : > { %v1998_v61 = vpop.permute.xlu0 %1997  ;;  %v2225_v6 = vsel %vm1222_vm4, %v2203_v0, 0.0  ;;  %v5359_v11 = vpack.c.bf16 %v4130_v23, %v4130_v23 }
 0x266   : > { %4131 = vpow2.f32 %v2096_v48  ;;  %v2064_v34 = vpack.c.bf16 %v2048_v55, %v2048_v55  ;;  %v2047_v47 = vsub.f32 %v5956_v2, %v1998_v61  ;;  %v1906_v49 = vunpack.c.l.bf16 %v1890_v56  ;;  %2226 = vadd.xlane.f32.xlu0 %v2225_v6 }
 0x267   : > { %3883 = vmatmul.msk.bf16.vlgmr.msra.gmra.mxu1 %vm1222_vm4, %v5347_v12  ;;  %3913 = vmatmul.msk.bf16.vlgmr.msrb.gmra.mxu3 %vm1222_vm4, %v5341_v32  ;;  %4133 = vpow2.f32 %v1938_v4 }
 0x268   : > { %v2080_v13 = vunpack.c.l.bf16 %v2064_v34  ;;  %v2063_v52 = vpack.c.bf16 %v2047_v47, %v2047_v47  ;;  %v1932_v22 = vmul.f32 1.442695, %v1906_v49  ;;  %3177 = vmatpush.bf16.msra.mxu1 %v3989_v5  ;;  %v5961_v47 = vld [vmem:[#allocation31_spill] sm:$0xff]  ;;  %v3990_v5 = vld [vmem:[%s4584_s18 + $0x10] sm:$0xff] }
 0x269   : > { %v1993_v53 = vpop.permute.xlu1 %1992 }
 0x26a   : > { %v2104_v50 = vmul.f32 1.442695, %v2080_v13  ;;  %v2079_v44 = vunpack.c.l.bf16 %v2063_v52  ;;  %4135 = vpow2.f32 %v1932_v22  ;;  %v2046_v18 = vsub.f32 %v5958_v15, %v1993_v53  ;;  %v5962_v13 = vld [vmem:[#allocation34_spill] sm:$0xff]  ;;  %v5963_v15 = vld [vmem:[#allocation35_spill] sm:$0xff] }
 0x26b   : > { %v2018_v3 = vpop.permute.xlu2 %2017 }
 0x26c   : > { %v4132_v16 = vpop.eup %4131  ;;  %4137 = vpow2.f32 %v2104_v50  ;;  %v2102_v62 = vmul.f32 1.442695, %v2079_v44  ;;  %v2051_v54 = vsub.f32 %v5959_v19, %v2018_v3  ;;  %v2062_v20 = vpack.c.bf16 %v2046_v18, %v2046_v18  ;;  %v3993_v3 = vld [vmem:[%s4584_s18 + $0x28] sm:$0xff] }
 0x26d   : > { %v5363_v10 = vpack.c.bf16 %v4132_v16, %v4132_v16  ;;  %v2013_v26 = vpop.permute.xlu0 %2012  ;;  %3878 = vmatmul.msk.bf16.vlgmr.msra.gmra.mxu0 %vm1222_vm4, %v5359_v11  ;;  %4139 = vpow2.f32 %v2098_v59  ;;  %v4134_v39 = vpop.eup %4133  ;;  %v3995_v16 = vld [vmem:[%s4584_s18 + $0x38] sm:$0xff] }
 0x26e   : > { %v2067_v24 = vpack.c.bf16 %v2051_v54, %v2051_v54  ;;  %v2050_v28 = vsub.f32 %v5960_v45, %v2013_v26  ;;  %4141 = vpow2.f32 %v2102_v62  ;;  %v2078_v60 = vunpack.c.l.bf16 %v2062_v20  ;;  %3149 = vmatpush.bf16.msra.mxu0 %v3988_v51  ;;  %3345 = vmatpush.bf16.msrb.mxu3 %v3995_v16 }
 0x26f   : > { %v2204_v14 = vunpack.c.l.bf16 %v5363_v10  ;;  %4143 = vpow2.f32 %v1936_v7  ;;  %v5380_v22 = vpack.c.bf16 %v4134_v39, %v4134_v39  ;;  %v3992_v39 = vld [vmem:[%s4584_s18 + $0x20] sm:$0xff]  ;;  %v3158_v16 = vunpack.c.l.b16 %v5268_v21 }
 0x270   : > { %v2083_v48 = vunpack.c.l.bf16 %v2067_v24  ;;  %v2066_v31 = vpack.c.bf16 %v2050_v28, %v2050_v28  ;;  %v4136_v55 = vpop.eup %4135  ;;  %v2100_v43 = vmul.f32 1.442695, %v2078_v60  ;;  %v3130_v21 = vunpack.c.l.b16 %v5322_v46 }
 0x271   : > { %v2228_v25 = vsel %vm1222_vm4, %v2204_v14, 0.0  ;;  %v5371_v61 = vpack.c.bf16 %v4136_v55, %v4136_v55  ;;  %v2008_v34 = vpop.permute.xlu1 %2007 }
 0x272   : > { %v4138_v56 = vpop.eup %4137  ;;  %v2110_v0 = vmul.f32 1.442695, %v2083_v48  ;;  %v2082_v4 = vunpack.c.l.bf16 %v2066_v31  ;;  %2229 = vadd.xlane.f32.xlu1 %v2228_v25  ;;  %4145 = vpow2.f32 %v2100_v43  ;;  %v2049_v49 = vsub.f32 %v5961_v47, %v2008_v34  ;;  %v5964_v31 = vld [vmem:[#allocation32_spill] sm:$0xff] }
 0x273   : > { %v5373_v2 = vpack.c.bf16 %v4138_v56, %v4138_v56  ;;  %v2033_v6 = vpop.permute.xlu2 %2032  ;;  %v4140_v23 = vpop.eup %4139  ;;  %3888 = vmatmul.msk.bf16.vlgmr.msra.gmra.mxu2 %vm1222_vm4, %v5371_v61 }
 0x274   : > { %v2108_v1 = vmul.f32 1.442695, %v2082_v4  ;;  %v2054_v52 = vsub.f32 %v5962_v13, %v2033_v6  ;;  %v4142_v30 = vpop.eup %4141  ;;  %4147 = vpow2.f32 %v2110_v0  ;;  %v2065_v59 = vpack.c.bf16 %v2049_v49, %v2049_v49  ;;  %3205 = vmatpush.bf16.msra.mxu2 %v3990_v5 }
 0x275   : > { %v2028_v50 = vpop.permute.xlu0 %2027  ;;  %v2208_v44 = vunpack.c.l.bf16 %v5373_v2  ;;  %v5386_v9 = vpack.c.bf16 %v4140_v23, %v4140_v23  ;;  %v4144_v54 = vpop.eup %4143  ;;  %v5391_v20 = vpack.c.bf16 %v4142_v30, %v4142_v30 }
 0x276   : > { %4149 = vpow2.f32 %v2108_v1  ;;  %v2070_v53 = vpack.c.bf16 %v2054_v52, %v2054_v52  ;;  %v2053_v18 = vsub.f32 %v5963_v15, %v2028_v50  ;;  %v2081_v62 = vunpack.c.l.bf16 %v2065_v59 }
 0x277   : > { %3903 = vmatmul.msk.bf16.vlgmr.msrb.gmra.mxu1 %vm1222_vm4, %v5380_v22  ;;  %v2240_v19 = vsel %vm1222_vm4, %v2208_v44, 0.0  ;;  %4151 = vpow2.f32 %v1940_v41  ;;  %v5394_v48 = vpack.c.bf16 %v4144_v54, %v4144_v54  ;;  %v2205_v43 = vunpack.c.l.bf16 %v5386_v9 }
 0x278   : > { %v2086_v26 = vunpack.c.l.bf16 %v2070_v53  ;;  %v2069_v7 = vpack.c.bf16 %v2053_v18, %v2053_v18  ;;  %2241 = vadd.xlane.f32.xlu2 %v2240_v19  ;;  %3289 = vmatpush.bf16.msrb.mxu1 %v3993_v3  ;;  %v4146_v24 = vpop.eup %4145  ;;  %v2106_v45 = vmul.f32 1.442695, %v2081_v62  ;;  %v3215_v56 = vunpack.c.l.b16 %v5391_v20  ;;  %v3994_v53 = vld [vmem:[%s4584_s18 + $0x30] sm:$0xff]  ;;  %v5965_v62 = vld [vmem:[#allocation36_spill] sm:$0xff]  ;;  %s3768_s18 = sshll.u32 %s4572_s14, 7 }
 0x279   : > { %v2126_v28 = vpack.c.bf16 %v4146_v24, %v4146_v24  ;;  %v2023_v14 = vpop.permute.xlu1 %2022  ;;  %v2231_v52 = vsel %vm1222_vm4, %v2205_v43, 0.0  ;;  %v3159_v59 = vunpack.c.l.b16 %v5338_v38  ;;  %s5745_s24 = scalar_lea.vmem [#allocation8], %s3768_s18  ;;  %s5749_s21 = scalar_lea.vmem [#allocation9], %s3768_s18 }
 0x27a   : > { %v2116_v51 = vmul.f32 1.442695, %v2086_v26  ;;  %v2085_v60 = vunpack.c.l.bf16 %v2069_v7  ;;  %v4148_v33 = vpop.eup %4147  ;;  %4153 = vpow2.f32 %v2106_v45  ;;  %v2052_v55 = vsub.f32 %v5964_v31, %v2023_v14  ;;  %s3562_s13 = sshll.u32 %s5749_s21, 4  ;;  %s3563_s13 = int_to_ptr.vmem [resolvable:$true] %s3562_s13 }
 0x27b   : > { %v3214_v0 = vunpack.c.l.b16 %v2126_v28  ;;  %v2206_v34 = vunpack.c.l.bf16 %v2126_v28  ;;  %v5404_v1 = vpack.c.bf16 %v4148_v33, %v4148_v33  ;;  %v3160_v7 = vpack.c.b16 %v3159_v59, %v3158_v16 }
 0x27c   : > { %v4150_v25 = vpop.eup %4149  ;;  %v2114_v4 = vmul.f32 1.442695, %v2085_v60  ;;  %v2068_v49 = vpack.c.bf16 %v2052_v55, %v2052_v55  ;;  %4155 = vpow2.f32 %v2116_v51  ;;  %v2207_v45 = vunpack.c.l.bf16 %v5391_v20 }
 0x27d   : > { %v5399_v47 = vpack.c.bf16 %v4150_v25, %v4150_v25  ;;  %3898 = vmatmul.msk.bf16.vlgmr.msrb.gmra.mxu0 %vm1222_vm4, %v5394_v48  ;;  %v3216_v6 = vpack.c.b16 %v3215_v56, %v3214_v0  ;;  %v2234_v23 = vsel %vm1222_vm4, %v2206_v34, 0.0  ;;  %v4152_v41 = vpop.eup %4151  ;;  %v2211_v54 = vunpack.c.l.bf16 %v5404_v1 }
 0x27e   : > { %3261 = vmatpush.bf16.msrb.mxu0 %v3992_v39  ;;  %v2084_v13 = vunpack.c.l.bf16 %v2068_v49  ;;  %2235 = vadd.xlane.f32.xlu0 %v2234_v23  ;;  %4157 = vpow2.f32 %v2114_v4  ;;  %v5412_v15 = vpack.c.bf16 %v4152_v41, %v4152_v41  ;;  %v3131_v31 = vunpack.c.l.b16 %v5297_v35 }
 0x27f   : > { %v2210_v5 = vunpack.c.l.bf16 %v5399_v47  ;;  %3933 = vmatmul.msk.bf16.vlgmr.msra.gmra.mxu3 %vm1222_vm4, %v3216_v6  ;;  %v2249_v39 = vsel %vm1222_vm4, %v2211_v54, 0.0  ;;  %v2237_v20 = vsel %vm1222_vm4, %v2207_v45, 0.0  ;;  %v3186_v34 = vunpack.c.l.b16 %v5363_v10 }
 0x280   : > { %2232 = vadd.xlane.f32.xlu2 %v2231_v52  ;;  %v4154_v30 = vpop.eup %4153  ;;  %v2112_v50 = vmul.f32 1.442695, %v2084_v13  ;;  %v3132_v56 = vpack.c.b16 %v3131_v31, %v3130_v21  ;;  %v3187_v6 = vunpack.c.l.b16 %v5386_v9  ;;  %v3270_v41 = vunpack.c.l.b16 %v5399_v47 }
 0x281   : > { %v2246_v44 = vsel %vm1222_vm4, %v2210_v5, 0.0  ;;  %v5414_v18 = vpack.c.bf16 %v4154_v30, %v4154_v30  ;;  %v2038_v3 = vpop.permute.xlu1 %2037  ;;  %v2143_v30 = vunpack.c.l.bf16 %v5276_v8  ;;  %v3271_v10 = vunpack.c.l.b16 %v5404_v1 }
 0x282   : > { %2247 = vadd.xlane.f32.xlu1 %v2246_v44  ;;  %4159 = vpow2.f32 %v2112_v50  ;;  %v2055_v19 = vsub.f32 %v5965_v62, %v2038_v3  ;;  %v4156_v26 = vpop.eup %4155  ;;  %v3188_v52 = vpack.c.b16 %v3187_v6, %v3186_v34  ;;  %v2139_v59 = vunpack.c.l.bf16 %v5257_v42 }
 0x283   : > { %3908 = vmatmul.msk.bf16.vlgmr.msrb.gmra.mxu2 %vm1222_vm4, %v5412_v15  ;;  %v2209_v38 = vunpack.c.l.bf16 %v5414_v18  ;;  %v2134_v60 = vpack.c.bf16 %v4156_v26, %v4156_v26  ;;  %v3272_v9 = vpack.c.b16 %v3271_v10, %v3270_v41  ;;  %v2173_v47 = vsel %vm1222_vm4, %v2143_v30, 0.0 }
 0x284   : > { %v2071_v24 = vpack.c.bf16 %v2055_v19, %v2055_v19  ;;  %3317 = vmatpush.bf16.msrb.mxu2 %v3994_v53  ;;  %v4158_v28 = vpop.eup %4157  ;;  %v2141_v53 = vunpack.c.l.bf16 %v5312_v29  ;;  %v3243_v16 = vunpack.c.l.b16 %v5414_v18  ;;  %v2161_v8 = vsel %vm1222_vm4, %v2139_v59, 0.0 }
 0x285   : > { %v2243_v51 = vsel %vm1222_vm4, %v2209_v38, 0.0  ;;  %v2133_v55 = vpack.c.bf16 %v4158_v28, %v4158_v28  ;;  %v2214_v46 = vunpack.c.l.bf16 %v2134_v60  ;;  %v3326_v50 = vunpack.c.l.b16 %v2134_v60 }
 0x286   : > { %v2087_v14 = vunpack.c.l.bf16 %v2071_v24  ;;  %2244 = vadd.xlane.f32.xlu0 %v2243_v51  ;;  %v3242_v42 = vunpack.c.l.b16 %v5373_v2  ;;  %v2167_v1 = vsel %vm1222_vm4, %v2141_v53, 0.0  ;;  %v2142_v19 = vunpack.c.l.bf16 %v5336_v58 }
 0x287   : > { %3923 = vmatmul.msk.bf16.vlgmr.msra.gmra.mxu1 %vm1222_vm4, %v3160_v7  ;;  %v2213_v4 = vunpack.c.l.bf16 %v2133_v55  ;;  %v2258_v35 = vsel %vm1222_vm4, %v2214_v46, 0.0  ;;  %v2138_v18 = vunpack.c.l.bf16 %v5306_v63  ;;  %v3299_v7 = vunpack.c.l.b16 %v2133_v55 }
 0x288   : > { %2250 = vadd.xlane.f32.xlu2 %v2249_v39  ;;  %v4160_v33 = vpop.eup %4159  ;;  %v2118_v43 = vmul.f32 1.442695, %v2087_v14  ;;  %v3244_v29 = vpack.c.b16 %v3243_v16, %v3242_v42  ;;  %v2170_v38 = vsel %vm1222_vm4, %v2142_v19, 0.0  ;;  %v2140_v45 = vunpack.c.l.bf16 %v5324_v27 }
 0x289   : > { %v2132_v25 = vpack.c.bf16 %v4160_v33, %v4160_v33  ;;  %v2255_v13 = vsel %vm1222_vm4, %v2213_v4, 0.0  ;;  %v2158_v2 = vsel %vm1222_vm4, %v2138_v18, 0.0  ;;  %v2137_v58 = vunpack.c.l.bf16 %v5283_v36 }
 0x28a   : > { %2238 = vadd.xlane.f32.xlu1 %v2237_v20  ;;  %4161 = vpow2.f32 %v2118_v43  ;;  %v2147_v63 = vunpack.c.l.bf16 %v5314_v57  ;;  %v2164_v28 = vsel %vm1222_vm4, %v2140_v45, 0.0  ;;  %v2136_v60 = vunpack.c.l.bf16 %v5293_v37 }
 0x28b   : > { %v2212_v0 = vunpack.c.l.bf16 %v2132_v25  ;;  %v3298_v54 = vunpack.c.l.b16 %v2132_v25  ;;  %v2155_v51 = vsel %vm1222_vm4, %v2137_v58, 0.0  ;;  %v2151_v14 = vunpack.c.l.bf16 %v5341_v32 }
 0x28c   : > { %v2185_v21 = vsel %vm1222_vm4, %v2147_v63, 0.0  ;;  %v2150_v27 = vunpack.c.l.bf16 %v5412_v15  ;;  %v2152_v36 = vsel %vm1222_vm4, %v2136_v60, 0.0  ;;  %v2149_v31 = vunpack.c.l.bf16 %v5380_v22 }
 0x28d   : > { %3918 = vmatmul.msk.bf16.vlgmr.msra.gmra.mxu0 %vm1222_vm4, %v3132_v56  ;;  %v2252_v49 = vsel %vm1222_vm4, %v2212_v0, 0.0  ;;  %v3300_v24 = vpack.c.b16 %v3299_v7, %v3298_v54  ;;  %v2197_v57 = vsel %vm1222_vm4, %v2151_v14, 0.0  ;;  %v2145_v55 = vunpack.c.l.bf16 %v5347_v12 }
 0x28e   : > { %2253 = vadd.xlane.f32.xlu0 %v2252_v49  ;;  %v2194_v33 = vsel %vm1222_vm4, %v2150_v27, 0.0  ;;  %v2144_v37 = vunpack.c.l.bf16 %v5359_v11  ;;  %v2191_v32 = vsel %vm1222_vm4, %v2149_v31, 0.0  ;;  %v2146_v25 = vunpack.c.l.bf16 %v5371_v61 }
 0x28f   : > { %v2179_v15 = vsel %vm1222_vm4, %v2145_v55, 0.0  ;;  %v2148_v56 = vunpack.c.l.bf16 %v5394_v48 }
 0x290   : > { %2259 = vadd.xlane.f32.xlu2 %v2258_v35  ;;  %v4162_v23 = vpop.eup %4161  ;;  %v2176_v20 = vsel %vm1222_vm4, %v2144_v37, 0.0  ;;  %v2182_v22 = vsel %vm1222_vm4, %v2146_v25, 0.0 }
 0x291   : > { %v2135_v5 = vpack.c.bf16 %v4162_v23, %v4162_v23  ;;  %v2188_v12 = vsel %vm1222_vm4, %v2148_v56, 0.0 }
 0x292   : > { %2256 = vadd.xlane.f32.xlu1 %v2255_v13 }
 0x293   : > { %v3327_v44 = vunpack.c.l.b16 %v2135_v5  ;;  %3928 = vmatmul.msk.bf16.vlgmr.msra.gmra.mxu2 %vm1222_vm4, %v3188_v52  ;;  %v2215_v62 = vunpack.c.l.bf16 %v2135_v5 }
 0x295   : > { %v3328_v3 = vpack.c.b16 %v3327_v44, %v3326_v50  ;;  %v2261_v26 = vsel %vm1222_vm4, %v2215_v62, 0.0 }
 0x296   : > { %2174 = vadd.xlane.f32.xlu0 %v2173_v47 }
 0x297   : > { %3943 = vmatmul.msk.bf16.vlgmr.msrb.gmra.mxu1 %vm1222_vm4, %v3272_v9  ;;  %3953 = vmatmul.msk.bf16.vlgmr.msrb.gmra.mxu3 %vm1222_vm4, %v3328_v3 }
 0x298   : > { %2162 = vadd.xlane.f32.xlu2 %v2161_v8 }
 0x29a   : > { %2168 = vadd.xlane.f32.xlu1 %v2167_v1 }
 0x29d   : > { %3938 = vmatmul.msk.bf16.vlgmr.msrb.gmra.mxu0 %vm1222_vm4, %v3244_v29 }
 0x29e   : > { %2262 = vadd.xlane.f32.xlu0 %v2261_v26 }
 0x2a0   : > { %2171 = vadd.xlane.f32.xlu2 %v2170_v38 }
 0x2a2   : > { %2159 = vadd.xlane.f32.xlu1 %v2158_v2 }
 0x2a3   : > { %3948 = vmatmul.msk.bf16.vlgmr.msrb.gmra.mxu2 %vm1222_vm4, %v3300_v24 }
 0x2a6   : > { %2165 = vadd.xlane.f32.xlu0 %v2164_v28 }
 0x2a8   : > { %2156 = vadd.xlane.f32.xlu2 %v2155_v51 }
 0x2aa   : > { %2186 = vadd.xlane.f32.xlu1 %v2185_v21 }
 0x2ae   : > { %2153 = vadd.xlane.f32.xlu0 %v2152_v36 }
 0x2b0   : > { %v2620_v39 = vpop.f32.mrf.mxu3  ;;  %2198 = vadd.xlane.f32.xlu2 %v2197_v57 }
 0x2b1   : > { %v2900_v11 = vrot.slane %v2620_v39, 4 }
 0x2b2   : > { %2195 = vadd.xlane.f32.xlu1 %v2194_v33 }
 0x2b5   : > { %v5493_v58 = vpop.xlane.xlu2 %2223 }
 0x2b6   : > { %2192 = vadd.xlane.f32.xlu0 %v2191_v32 }
 0x2b8   : > { %v2622_v43 = vpop.f32.mrf.mxu3  ;;  %2180 = vadd.xlane.f32.xlu2 %v2179_v15 }
 0x2ba   : > { %2177 = vadd.xlane.f32.xlu1 %v2176_v20 }
 0x2be   : > { %2183 = vadd.xlane.f32.xlu0 %v2182_v22 }
 0x2c0   : > { %2189 = vadd.xlane.f32.xlu2 %v2188_v12 }
 0x2c4   : > { %v2576_v46 = vpop.f32.mrf.mxu1 }
 0x2c5   : > { %v2901_v0 = vsel %vm506_vm1, %v2900_v11, %v2576_v46  ;;  %v2902_v4 = vrot.slane %v2576_v46, 4  ;;  %v5495_v51 = vpop.xlane.xlu1 %2220 }
 0x2c6   : > { %v2708_v49 = vpop.f32.mrf.mxu3  ;;  %v2907_v10 = vperm.slane %v2901_v0, %v4625_v17 }
 0x2c7   : > { %v2903_v34 = vsel %vm506_vm1, %v2620_v39, %v2902_v4  ;;  %v2924_v41 = vrot.slane %v2708_v49, 4 }
 0x2c8   : > { %v2911_v13 = vperm.slane %v2903_v34, %v4625_v17  ;;  %v2936_v42 = vrot.slane %v2907_v10, 4 }
 0x2ca   : > { %v2554_v35 = vpop.f32.mrf.mxu0  ;;  %v2948_v53 = vrot.slane %v2911_v13, 4 }
 0x2cb   : > { %v2890_v30 = vrot.slane %v2554_v35, 4 }
 0x2cc   : > { %v2578_v6 = vpop.f32.mrf.mxu1 }
 0x2ce   : > { %v2710_v23 = vpop.f32.mrf.mxu3 }
 0x2d1   : > { %v5490_v38 = vpop.xlane.xlu0 %2217 }
 0x2d2   : > { %v2556_v61 = vpop.f32.mrf.mxu0 }
 0x2d4   : > { %v2664_v48 = vpop.f32.mrf.mxu1 }
 0x2d5   : > { %v2925_v52 = vsel %vm506_vm1, %v2924_v41, %v2664_v48  ;;  %v2926_v5 = vrot.slane %v2664_v48, 4 }
 0x2d6   : > { %v2598_v50 = vpop.f32.mrf.mxu2  ;;  %v2931_v36 = vperm.slane %v2925_v52, %v4625_v17 }
 0x2d7   : > { %v2927_v59 = vsel %vm506_vm1, %v2708_v49, %v2926_v5  ;;  %v2888_v44 = vrot.slane %v2598_v50, 4  ;;  %v2891_v9 = vsel %vm506_vm1, %v2598_v50, %v2890_v30 }
 0x2d8   : > { %v2899_v3 = vperm.slane %v2891_v9, %v4625_v17  ;;  %v2935_v14 = vperm.slane %v2927_v59, %v4625_v17  ;;  %v2960_v12 = vrot.slane %v2931_v36, 4 }
 0x2d9   : > { %v2889_v47 = vsel %vm506_vm1, %v2888_v44, %v2554_v35  ;;  %v5503_v37 = vpop.xlane.xlu0 %2226 }
 0x2da   : > { %v2642_v16 = vpop.f32.mrf.mxu0  ;;  %v2796_v8 = vpop.f32.mrf.mxu3  ;;  %v2895_v1 = vperm.slane %v2889_v47, %v4625_v17  ;;  %v2949_v62 = vsel %vm506_vm1, %v2948_v53, %v2899_v3  ;;  %v2950_v29 = vrot.slane %v2899_v3, 4  ;;  %v2972_v15 = vrot.slane %v2935_v14, 4 }
 0x2db   : > { %v3012_v63 = vrot.slane %v2796_v8, 4  ;;  %v2914_v27 = vrot.slane %v2642_v16, 4  ;;  %v2955_v55 = vperm.slane %v2949_v62, %v4644_v40 }
 0x2dc   : > { %v2666_v19 = vpop.f32.mrf.mxu1  ;;  %v2938_v18 = vrot.slane %v2895_v1, 4  ;;  %v2937_v54 = vsel %vm506_vm1, %v2936_v42, %v2895_v1  ;;  %v2951_v26 = vsel %vm506_vm1, %v2911_v13, %v2950_v29 }
 0x2dd   : > { %v2943_v56 = vperm.slane %v2937_v54, %v4644_v40  ;;  %v2959_v22 = vperm.slane %v2951_v26, %v4644_v40  ;;  %v2994_v35 = vrot.slane %v2955_v55, 4 }
 0x2de   : > { %v2600_v7 = vpop.f32.mrf.mxu2  ;;  %v2939_v2 = vsel %vm506_vm1, %v2907_v10, %v2938_v18 }
 0x2df   : > { %v2947_v4 = vperm.slane %v2939_v2, %v4644_v40  ;;  %v2986_v52 = vrot.slane %v2943_v56, 4  ;;  %v2998_v30 = vrot.slane %v2959_v22, 4 }
 0x2e1   : > { %v2990_v50 = vrot.slane %v2947_v4, 4 }
 0x2e2   : > { %v2644_v24 = vpop.f32.mrf.mxu0  ;;  %v2798_v45 = vpop.f32.mrf.mxu3 }
 0x2e4   : > { %v2752_v28 = vpop.f32.mrf.mxu1 }
 0x2e5   : > { %v3013_v21 = vsel %vm506_vm1, %v3012_v63, %v2752_v28  ;;  %v3014_v60 = vrot.slane %v2752_v28, 4  ;;  %v5514_v6 = vpop.xlane.xlu1 %2229 }
 0x2e6   : > { %v2686_v39 = vpop.f32.mrf.mxu2 }
 0x2e7   : > { %v3015_v57 = vsel %vm506_vm1, %v2796_v8, %v3014_v60  ;;  %v2912_v33 = vrot.slane %v2686_v39, 4  ;;  %v2915_v31 = vsel %vm506_vm1, %v2686_v39, %v2914_v27 }
 0x2e8   : > { %v2923_v32 = vperm.slane %v2915_v31, %v4625_v17  ;;  %v3023_v63 = vperm.slane %v3015_v57, %v4625_v17 }
 0x2e9   : > { %v2913_v43 = vsel %vm506_vm1, %v2912_v33, %v2642_v16 }
 0x2ea   : > { %v2730_v20 = vpop.f32.mrf.mxu0  ;;  %v2884_v25 = vpop.f32.mrf.mxu3  ;;  %v2919_v11 = vperm.slane %v2913_v43, %v4625_v17  ;;  %v2974_v46 = vrot.slane %v2923_v32, 4  ;;  %v2973_v49 = vsel %vm506_vm1, %v2972_v15, %v2923_v32  ;;  %v3060_v32 = vrot.slane %v3023_v63, 4 }
 0x2eb   : > { %v5510_v0 = vpop.xlane.xlu2 %2241  ;;  %v2979_v41 = vperm.slane %v2973_v49, %v4644_v40  ;;  %v3036_v54 = vrot.slane %v2884_v25, 4  ;;  %v3002_v27 = vrot.slane %v2730_v20, 4 }
 0x2ec   : > { %v2754_v34 = vpop.f32.mrf.mxu1  ;;  %v2962_v23 = vrot.slane %v2919_v11, 4  ;;  %v2961_v61 = vsel %vm506_vm1, %v2960_v12, %v2919_v11  ;;  %v2975_v48 = vsel %vm506_vm1, %v2935_v14, %v2974_v46 }
 0x2ed   : > { %v2967_v13 = vperm.slane %v2961_v61, %v4644_v40  ;;  %v2983_v5 = vperm.slane %v2975_v48, %v4644_v40  ;;  %v5523_v44 = vsel %vm506_vm1, %v2979_v41, %v2994_v35  ;;  %v2992_v9 = vrot.slane %v2979_v41, 4 }
 0x2ee   : > { %v2688_v10 = vpop.f32.mrf.mxu2  ;;  %v2963_v59 = vsel %vm506_vm1, %v2931_v36, %v2962_v23  ;;  %v3019_v36 = vperm.slane %v3013_v21, %v4625_v17 }
 0x2ef   : > { %v2971_v53 = vperm.slane %v2963_v59, %v4644_v40  ;;  %v5527_v3 = vsel %vm506_vm1, %v2967_v13, %v2986_v52  ;;  %v2984_v47 = vrot.slane %v2967_v13, 4  ;;  %v5530_v16 = vsel %vm506_vm1, %v2983_v5, %v2998_v30 }
 0x2f0   : > { %v5533_v8 = vsel %vm506_vm1, %v2992_v9, %v2955_v55  ;;  %v2996_v42 = vrot.slane %v2983_v5, 4 }
 0x2f1   : > { %v5535_v1 = vpop.xlane.xlu0 %2235  ;;  %v5538_v29 = vsel %vm506_vm1, %v2971_v53, %v2990_v50  ;;  %v5541_v19 = vsel %vm506_vm1, %v2984_v47, %v2943_v56  ;;  %v2988_v18 = vrot.slane %v2971_v53, 4 }
 0x2f2   : > { %v2732_v62 = vpop.f32.mrf.mxu0  ;;  %v2886_v26 = vpop.f32.mrf.mxu3  ;;  %v5546_v2 = vsel %vm506_vm1, %v2996_v42, %v2959_v22  ;;  %v3048_v22 = vrot.slane %v3019_v36, 4 }
 0x2f3   : > { %v5543_v7 = vpop.xlane.xlu2 %2232  ;;  %v5549_v45 = vsel %vm506_vm1, %v2988_v18, %v2947_v4 }
 0x2f4   : > { %v2840_v24 = vpop.f32.mrf.mxu1 }
 0x2f5   : > { %v3037_v28 = vsel %vm506_vm1, %v3036_v54, %v2840_v24  ;;  %v3038_v60 = vrot.slane %v2840_v24, 4  ;;  %v5553_v14 = vpop.xlane.xlu1 %2247 }
 0x2f6   : > { %v2774_v33 = vpop.f32.mrf.mxu2  ;;  %v3043_v30 = vperm.slane %v3037_v28, %v4625_v17 }
 0x2f7   : > { %v3039_v39 = vsel %vm506_vm1, %v2884_v25, %v3038_v60  ;;  %v3000_v31 = vrot.slane %v2774_v33, 4  ;;  %v3003_v55 = vsel %vm506_vm1, %v2774_v33, %v3002_v27 }
 0x2f8   : > { %v3011_v15 = vperm.slane %v3003_v55, %v4625_v17  ;;  %v3047_v52 = vperm.slane %v3039_v39, %v4625_v17  ;;  %v3072_v54 = vrot.slane %v3043_v30, 4 }
 0x2f9   : > { %v3001_v43 = vsel %vm506_vm1, %v3000_v31, %v2730_v20  ;;  %v5560_v57 = vpop.xlane.xlu0 %2244 }
 0x2fa   : > { %v2818_v56 = vpop.f32.mrf.mxu0  ;;  %v3007_v12 = vperm.slane %v3001_v43, %v4625_v17  ;;  %v3061_v11 = vsel %vm506_vm1, %v3060_v32, %v3011_v15  ;;  %v3062_v21 = vrot.slane %v3011_v15, 4  ;;  %v3084_v47 = vrot.slane %v3047_v52, 4 }
 0x2fb   : > { %v5564_v46 = vpop.xlane.xlu2 %2250  ;;  %v3026_v5 = vrot.slane %v2818_v56, 4  ;;  %v3067_v9 = vperm.slane %v3061_v11, %v4644_v40 }
 0x2fc   : > { %v2842_v25 = vpop.f32.mrf.mxu1  ;;  %v3050_v4 = vrot.slane %v3007_v12, 4  ;;  %v3049_v49 = vsel %vm506_vm1, %v3048_v22, %v3007_v12  ;;  %v3063_v35 = vsel %vm506_vm1, %v3023_v63, %v3062_v21 }
 0x2fd   : > { %v5566_v34 = vpop.xlane.xlu1 %2238  ;;  %v3055_v18 = vperm.slane %v3049_v49, %v4644_v40  ;;  %v3071_v28 = vperm.slane %v3063_v35, %v4644_v40 }
 0x2fe   : > { %v2776_v20 = vpop.f32.mrf.mxu2  ;;  %v3051_v23 = vsel %vm506_vm1, %v3019_v36, %v3050_v4  ;;  %v3106_v36 = vrot.slane %v3067_v9, 4 }
 0x2ff   : > { %v3059_v60 = vperm.slane %v3051_v23, %v4644_v40  ;;  %v3098_v43 = vrot.slane %v3055_v18, 4  ;;  %v3110_v25 = vrot.slane %v3071_v28, 4 }
 0x301   : > { %v5571_v61 = vpop.xlane.xlu0 %2253  ;;  %v3102_v49 = vrot.slane %v3059_v60, 4 }
 0x302   : > { %v2820_v41 = vpop.f32.mrf.mxu0 }
 0x303   : > { %v5573_v48 = vpop.xlane.xlu2 %2259 }
 0x305   : > { %v5575_v13 = vpop.xlane.xlu1 %2256 }
 0x306   : > { %v2862_v10 = vpop.f32.mrf.mxu2 }
 0x307   : > { %v3024_v59 = vrot.slane %v2862_v10, 4  ;;  %v3027_v50 = vsel %vm506_vm1, %v2862_v10, %v3026_v5 }
 0x308   : > { %v3035_v53 = vperm.slane %v3027_v50, %v4625_v17 }
 0x309   : > { %v3025_v42 = vsel %vm506_vm1, %v3024_v59, %v2818_v56  ;;  %v2175_v62 = vpop.xlane.xlu0 %2174 }
 0x30a   : > { %v3031_v26 = vperm.slane %v3025_v42, %v4625_v17  ;;  %v3086_v24 = vrot.slane %v3035_v53, 4  ;;  %v3085_v27 = vsel %vm506_vm1, %v3084_v47, %v3035_v53  ;;  %v2300_v47 = vrot.slane %v2175_v62, 4 }
 0x30b   : > { %v2163_v63 = vpop.xlane.xlu2 %2162  ;;  %v3091_v55 = vperm.slane %v3085_v27, %v4644_v40 }
 0x30c   : > { %v3074_v39 = vrot.slane %v3031_v26, 4  ;;  %v3073_v33 = vsel %vm506_vm1, %v3072_v54, %v3031_v26  ;;  %v3087_v32 = vsel %vm506_vm1, %v3047_v52, %v3086_v24 }
 0x30d   : > { %v2169_v31 = vpop.xlane.xlu1 %2168  ;;  %v3079_v15 = vperm.slane %v3073_v33, %v4644_v40  ;;  %v3095_v56 = vperm.slane %v3087_v32, %v4644_v40  ;;  %v5595_v11 = vsel %vm506_vm1, %v3091_v55, %v3106_v36  ;;  %v3104_v21 = vrot.slane %v3091_v55, 4 }
 0x30e   : > { %v3075_v22 = vsel %vm506_vm1, %v3043_v30, %v3074_v39  ;;  %v2864_v12 = vpop.f32.mrf.mxu2  ;;  %v2301_v54 = vsel %vm506_vm1, %v2300_v47, %v2169_v31  ;;  %v2302_v26 = vrot.slane %v2169_v31, 4  ;;  %v2276_v36 = vrot.slane %v2163_v63, 4 }
 0x30f   : > { %v3083_v4 = vperm.slane %v3075_v22, %v4644_v40  ;;  %v5599_v35 = vsel %vm506_vm1, %v3079_v15, %v3098_v43  ;;  %v3096_v20 = vrot.slane %v3079_v15, 4  ;;  %v5602_v23 = vsel %vm506_vm1, %v3104_v21, %v3067_v9 }
 0x310   : > { %v5613_v10 = vsel %vm506_vm1, %v3095_v56, %v3110_v25  ;;  %v3108_v50 = vrot.slane %v3095_v56, 4  ;;  %v2303_v39 = vsel %vm506_vm1, %v2175_v62, %v2302_v26 }
 0x311   : > { %v5605_v41 = vsel %vm506_vm1, %v3083_v4, %v3102_v49  ;;  %v5607_v52 = vpop.xlane.xlu0 %2262  ;;  %v5610_v5 = vsel %vm506_vm1, %v3096_v20, %v3055_v18  ;;  %v3100_v30 = vrot.slane %v3083_v4, 4  ;;  %v2307_v18 = vperm.slane %v2301_v54, %v4625_v17 }
 0x312   : > { %v5619_v42 = vsel %vm506_vm1, %v3108_v50, %v3071_v28  ;;  %v2311_v31 = vperm.slane %v2303_v39, %v4625_v17 }
 0x313   : > { %v2172_v59 = vpop.xlane.xlu2 %2171  ;;  %v5616_v53 = vsel %vm506_vm1, %v3100_v30, %v3059_v60  ;;  %v2336_v22 = vrot.slane %v2307_v18, 4 }
 0x314   : > { %v2288_v24 = vrot.slane %v2172_v59, 4  ;;  %v2348_v49 = vrot.slane %v2311_v31, 4 }
 0x315   : > { %v2160_v9 = vpop.xlane.xlu1 %2159 }
 0x316   : > { %v2264_v4 = vrot.slane %v2160_v9, 4 }
 0x319   : > { %v2166_v27 = vpop.xlane.xlu0 %2165 }
 0x31a   : > { %v2289_v33 = vsel %vm506_vm1, %v2288_v24, %v2166_v27  ;;  %v2290_v55 = vrot.slane %v2166_v27, 4 }
 0x31b   : > { %v2157_v60 = vpop.xlane.xlu2 %2156  ;;  %v2295_v32 = vperm.slane %v2289_v33, %v4625_v17 }
 0x31c   : > { %v2278_v15 = vrot.slane %v2157_v60, 4  ;;  %v2291_v28 = vsel %vm506_vm1, %v2172_v59, %v2290_v55  ;;  %v2277_v43 = vsel %vm506_vm1, %v2276_v36, %v2157_v60 }
 0x31d   : > { %v5628_v56 = vpop.xlane.xlu1 %2186  ;;  %v2299_v12 = vperm.slane %v2291_v28, %v4625_v17  ;;  %v2337_v62 = vsel %vm506_vm1, %v2336_v22, %v2295_v32  ;;  %v2283_v25 = vperm.slane %v2277_v43, %v4625_v17  ;;  %v2338_v30 = vrot.slane %v2295_v32, 4 }
 0x31e   : > { %v2279_v21 = vsel %vm506_vm1, %v2163_v63, %v2278_v15  ;;  %v2343_v59 = vperm.slane %v2337_v62, %v4644_v40 }
 0x31f   : > { %v2287_v50 = vperm.slane %v2279_v21, %v4625_v17  ;;  %v2350_v26 = vrot.slane %v2299_v12, 4  ;;  %v2312_v24 = vrot.slane %v2283_v25, 4  ;;  %v2349_v63 = vsel %vm506_vm1, %v2348_v49, %v2299_v12 }
 0x320   : > { %v2360_v32 = vrot.slane %v2343_v59, 4  ;;  %v2339_v22 = vsel %vm506_vm1, %v2307_v18, %v2338_v30  ;;  %v5649_v21 = vperm.slane %v2349_v63, %v4644_v40 }
 0x321   : > { %v2154_v20 = vpop.xlane.xlu0 %2153  ;;  %v2324_v15 = vrot.slane %v2287_v50, 4  ;;  %v2351_v62 = vsel %vm506_vm1, %v2311_v31, %v2350_v26  ;;  %v2347_v26 = vperm.slane %v2339_v22, %v4644_v40 }
 0x322   : > { %v2265_v47 = vsel %vm506_vm1, %v2264_v4, %v2154_v20  ;;  %v2266_v27 = vrot.slane %v2154_v20, 4  ;;  %v2368_v63 = vrot.slane %v5649_v21, 4 }
 0x323   : > { %v2199_v54 = vpop.xlane.xlu2 %2198  ;;  %v2271_v36 = vperm.slane %v2265_v47, %v4625_v17 }
 0x324   : > { %v2267_v39 = vsel %vm506_vm1, %v2160_v9, %v2266_v27  ;;  %v2412_v30 = vrot.slane %v2199_v54, 4  ;;  %v2388_v27 = vrot.slane %v5628_v56, 4 }
 0x325   : > { %v2313_v33 = vsel %vm506_vm1, %v2312_v24, %v2271_v36  ;;  %v2314_v55 = vrot.slane %v2271_v36, 4  ;;  %v5642_v60 = vpop.xlane.xlu1 %2195  ;;  %v2275_v28 = vperm.slane %v2267_v39, %v4625_v17  ;;  %v5662_v36 = vperm.slane %v2351_v62, %v4644_v40 }
 0x326   : > { %v2319_v43 = vperm.slane %v2313_v33, %v4644_v40 }
 0x327   : > { %v2315_v9 = vsel %vm506_vm1, %v2283_v25, %v2314_v55  ;;  %v2325_v4 = vsel %vm506_vm1, %v2324_v15, %v2275_v28  ;;  %v2326_v49 = vrot.slane %v2275_v28, 4 }
 0x328   : > { %v2323_v12 = vperm.slane %v2315_v9, %v4644_v40  ;;  %v2361_v20 = vsel %vm506_vm1, %v2360_v32, %v2319_v43  ;;  %v5656_v47 = vperm.slane %v2325_v4, %v4644_v40  ;;  %v2362_v24 = vrot.slane %v2319_v43, 4 }
 0x329   : > { %v2488_v18 = vadd.f32 %v2361_v20, %v5490_v38  ;;  %v2193_v31 = vpop.xlane.xlu0 %2192  ;;  %v2327_v33 = vsel %vm506_vm1, %v2287_v50, %v2326_v49  ;;  %v2364_v43 = vrot.slane %v2347_v26, 4  ;;  %v2372_v4 = vrot.slane %v5662_v36, 4 }
 0x32a   : > { %v2413_v39 = vsel %vm506_vm1, %v2412_v30, %v2193_v31  ;;  %v2366_v55 = vrot.slane %v2323_v12, 4  ;;  %v2414_v32 = vrot.slane %v2193_v31, 4  ;;  %v2363_v38 = vsel %vm506_vm1, %v2343_v59, %v2362_v24 }
 0x32b   : > { %v2181_v25 = vpop.xlane.xlu2 %2180  ;;  %4163 = vrcp.f32 %v2488_v18  ;;  %v2369_v28 = vsel %vm506_vm1, %v2368_v63, %v5656_v47  ;;  %v2419_v62 = vperm.slane %v2413_v39, %v4625_v17  ;;  %v5676_v50 = vperm.slane %v2327_v33, %v4644_v40 }
 0x32c   : > { %v2389_v15 = vsel %vm506_vm1, %v2388_v27, %v2181_v25  ;;  %v2415_v22 = vsel %vm506_vm1, %v2199_v54, %v2414_v32  ;;  %v2496_v9 = vadd.f32 %v2369_v28, %v5510_v0  ;;  %v2400_v49 = vrot.slane %v5642_v60, 4 }
 0x32d   : > { %v2390_v59 = vrot.slane %v2181_v25, 4  ;;  %v2178_v20 = vpop.xlane.xlu1 %2177  ;;  %v2395_v24 = vperm.slane %v2389_v15, %v4625_v17  ;;  %v2490_v18 = vadd.f32 %v2363_v38, %v5493_v58  ;;  %v2367_v54 = vsel %vm506_vm1, %v2347_v26, %v2366_v55 }
 0x32e   : > { %4165 = vrcp.f32 %v2496_v9  ;;  %v2365_v31 = vsel %vm506_vm1, %v2364_v43, %v2323_v12  ;;  %v2370_v0 = vrot.slane %v5656_v47, 4  ;;  %v2423_v27 = vperm.slane %v2415_v22, %v4625_v17 }
 0x32f   : > { %v2494_v39 = vadd.f32 %v2367_v54, %v5535_v1  ;;  %v2448_v33 = vrot.slane %v2419_v62, 4  ;;  %v2378_v25 = vrot.slane %v2178_v20, 4  ;;  %4167 = vrcp.f32 %v2490_v18 }
 0x330   : > { %v2391_v58 = vsel %vm506_vm1, %v5628_v56, %v2390_v59  ;;  %v2424_v12 = vrot.slane %v2395_v24, 4  ;;  %v2373_v1 = vsel %vm506_vm1, %v2372_v4, %v5676_v50  ;;  %v2460_v28 = vrot.slane %v2423_v27, 4 }
 0x331   : > { %v4164_v30 = vpop.eup %4163  ;;  %v2184_v63 = vpop.xlane.xlu0 %2183  ;;  %4169 = vrcp.f32 %v2494_v39  ;;  %v2492_v56 = vadd.f32 %v2365_v31, %v5514_v6  ;;  %v2500_v39 = vadd.f32 %v2373_v1, %v5571_v61 }
 0x332   : > { %v2376_v32 = vrot.slane %v2184_v63, 4  ;;  %3387 = vperm.xlu1 %4096, %v4164_v30  }
 0x333   : > { %v2190_v15 = vpop.xlane.xlu2 %2189  ;;  %4171 = vrcp.f32 %v2492_v56 }
 0x334   : > { %v2401_v26 = vsel %vm506_vm1, %v2400_v49, %v2190_v15  ;;  %v2402_v55 = vrot.slane %v2190_v15, 4  ;;  %v2377_v47 = vsel %vm506_vm1, %v2376_v32, %v2178_v20  ;;  %v4166_v9 = vpop.eup %4165  ;;  %v2379_v49 = vsel %vm506_vm1, %v2184_v63, %v2378_v25 }
 0x335   : > { %v2407_v38 = vperm.slane %v2401_v26, %v4625_v17  ;;  %v2383_v43 = vperm.slane %v2377_v47, %v4625_v17  ;;  %3427 = vperm.xlu2 %4097, %v4166_v9   ;;  %v4168_v32 = vpop.eup %4167  ;;  %v2399_v63 = vperm.slane %v2391_v58, %v4625_v17  ;;  %v2387_v15 = vperm.slane %v2379_v49, %v4625_v17 }
 0x336   : > { %v2403_v22 = vsel %vm506_vm1, %v5642_v60, %v2402_v55  ;;  %3397 = vperm.xlu0 %4098, %v4168_v32   ;;  %4173 = vrcp.f32 %v2500_v39 }
 0x337   : > { %v2411_v59 = vperm.slane %v2403_v22, %v4625_v17  ;;  %v2449_v20 = vsel %vm506_vm1, %v2448_v33, %v2407_v38  ;;  %v2450_v18 = vrot.slane %v2407_v38, 4  ;;  %v2425_v54 = vsel %vm506_vm1, %v2424_v12, %v2383_v43  ;;  %v4170_v31 = vpop.eup %4169 }
 0x338   : > { %v2426_v30 = vrot.slane %v2383_v43, 4  ;;  %v2455_v4 = vperm.slane %v2449_v20, %v4644_v40  ;;  %v2431_v60 = vperm.slane %v2425_v54, %v4644_v40  ;;  %v2436_v38 = vrot.slane %v2399_v63, 4 }
 0x339   : > { %v2451_v6 = vsel %vm506_vm1, %v2419_v62, %v2450_v18  ;;  %v2461_v33 = vsel %vm506_vm1, %v2460_v28, %v2411_v59  ;;  %v2371_v62 = vsel %vm506_vm1, %v5649_v21, %v2370_v0  ;;  %v2462_v58 = vrot.slane %v2411_v59, 4  ;;  %v4172_v21 = vpop.eup %4171 }
 0x33a   : > { %v2427_v25 = vsel %vm506_vm1, %v2395_v24, %v2426_v30  ;;  %v2474_v26 = vrot.slane %v2431_v60, 4  ;;  %v2459_v55 = vperm.slane %v2451_v6, %v4644_v40  ;;  %3417 = vperm.xlu1 %4096, %v4170_v31   ;;  %v2472_v12 = vrot.slane %v2455_v4, 4 }
 0x33b   : > { %v2435_v61 = vperm.slane %v2427_v25, %v4644_v40  ;;  %v2467_v24 = vperm.slane %v2461_v33, %v4644_v40  ;;  %v2498_v28 = vadd.f32 %v2371_v62, %v5553_v14  ;;  %v2437_v22 = vsel %vm506_vm1, %v2436_v38, %v2387_v15 }
 0x33c   : > { %v2475_v47 = vsel %vm506_vm1, %v2455_v4, %v2474_v26  ;;  %v2473_v17 = vsel %vm506_vm1, %v2472_v12, %v2431_v60  ;;  %v2476_v1 = vrot.slane %v2459_v55, 4  ;;  %v2438_v56 = vrot.slane %v2387_v15, 4  ;;  %v4174_v20 = vpop.eup %4173 }
 0x33d   : > { %v2489_v43 = vadd.f32 %v2473_v17, %v5495_v51  ;;  %v2478_v9 = vrot.slane %v2435_v61, 4  ;;  %v2491_v49 = vadd.f32 %v2475_v47, %v5503_v37  ;;  %v2463_v0 = vsel %vm506_vm1, %v2423_v27, %v2462_v58  ;;  %v3151_v47 = vpop.f32.mrf.mxu0 }
 0x33e   : > { %v2480_v59 = vrot.slane %v2467_v24, 4  ;;  %3407 = vperm.xlu0 %4098, %v4172_v21   ;;  %v2443_v18 = vperm.slane %v2437_v22, %v4644_v40  ;;  %v2477_v14 = vsel %vm506_vm1, %v2476_v1, %v2435_v61  ;;  %v2439_v51 = vsel %vm506_vm1, %v2399_v63, %v2438_v56  ;;  %v3179_v1 = vpop.f32.mrf.mxu1  ;;  %v3506_v22 = vld [vmem:[%s5745_s24 + $0x40] sm:$0xff] }
 0x33f   : > { %4175 = vrcp.f32 %v2489_v43  ;;  %v2471_v54 = vperm.slane %v2463_v0, %v4644_v40  ;;  %v2479_v30 = vsel %vm506_vm1, %v2459_v55, %v2478_v9  ;;  %v2493_v27 = vadd.f32 %v2477_v14, %v5543_v7 }
 0x340   : > { %4177 = vrcp.f32 %v2498_v28  ;;  %v2481_v37 = vsel %vm506_vm1, %v2480_v59, %v2443_v18  ;;  %v2447_v4 = vperm.slane %v2439_v51, %v4644_v40  ;;  %v2495_v39 = vadd.f32 %v2479_v30, %v5566_v34  ;;  %v3235_v59 = vpop.f32.mrf.mxu3  ;;  %v3499_v51 = vld [vmem:[%s5745_s24 + $0x8] sm:$0xff] }
 0x341   : > { %4179 = vrcp.f32 %v2491_v49  ;;  %v2484_v60 = vrot.slane %v2471_v54, 4  ;;  %v2497_v6 = vadd.f32 %v2481_v37, %v5560_v57  ;;  %v2482_v25 = vrot.slane %v2443_v18, 4 }
 0x342   : > { %3447 = vperm.xlu1 %4096, %v4174_v20   ;;  %4181 = vrcp.f32 %v2493_v27  ;;  %v2486_v33 = vrot.slane %v2447_v4, 4  ;;  %v2374_v57 = vrot.slane %v5676_v50, 4  ;;  %v5743_v28 = vstv %s3368_s5 }
 0x343   : > { %4183 = vrcp.f32 %v2495_v39  ;;  %v2483_v15 = vsel %vm506_vm1, %v2467_v24, %v2482_v25  ;;  %v2485_v40 = vsel %vm506_vm1, %v2484_v60, %v2447_v4  ;;  %v3369_v20 = vadd.f32 %v3151_v47, %v5541_v19  ;;  %v3498_v4 = vld [vmem:[%s5745_s24] sm:$0xff] }
 0x344   : > { %4185 = vrcp.f32 %v2497_v6  ;;  %v2487_v7 = vsel %vm506_vm1, %v2471_v54, %v2486_v33  ;;  %v2499_v34 = vadd.f32 %v2483_v15, %v5564_v46  ;;  %v2501_v26 = vadd.f32 %v2485_v40, %v5575_v13  ;;  %v3503_v15 = vld [vmem:[%s5745_s24 + $0x28] sm:$0xff] }
 0x345   : > { %v4176_v32 = vpop.eup %4175  ;;  %v2503_v61 = vadd.f32 %v2487_v7, %v5607_v52  ;;  %v2375_v58 = vsel %vm506_vm1, %v5662_v36, %v2374_v57  ;;  %v3153_v38 = vpop.f32.mrf.mxu0  ;;  %v3371_v60 = vadd.f32 %v3179_v1, %v5527_v3  ;;  %v3500_v7 = vld [vmem:[%s5745_s24 + $0x10] sm:$0xff]  ;;  %v3502_v1 = vld [vmem:[%s5745_s24 + $0x20] sm:$0xff] }
 0x346   : > { %v4178_v31 = vpop.eup %4177  ;;  %3392 = vperm.xlu2 %4097, %v4176_v32   ;;  %4187 = vrcp.f32 %v2499_v34  ;;  %v2502_v46 = vadd.f32 %v2375_v58, %v5573_v48  ;;  %v5753_v49 = vpop.f32.mrf.mxu1  ;;  %v3370_v21 = vadd.f32 %v3153_v38, %v5610_v5 }
 0x347   : > { %v4180_v63 = vpop.eup %4179  ;;  %3437 = vperm.xlu0 %4098, %v4178_v31   ;;  %4189 = vrcp.f32 %v2501_v26  ;;  %v3375_v31 = vadd.f32 %v3235_v59, %v5538_v29 }
 0x348   : > { %v4182_v55 = vpop.eup %4181  ;;  %4191 = vrcp.f32 %v2503_v61  ;;  %v3237_v57 = vpop.f32.mrf.mxu3 }
 0x349   : > { %v4184_v12 = vpop.eup %4183  ;;  %4193 = vrcp.f32 %v2502_v46 }
 0x34a   : > { %3402 = vperm.xlu1 %4096, %v4180_v63   ;;  %v4186_v62 = vpop.eup %4185 }
 0x34c   : > { %v4188_v50 = vpop.eup %4187 }
 0x34d   : > { %v4190_v24 = vpop.eup %4189  ;;  %v3263_v17 = vpop.f32.mrf.mxu0 }
 0x34e   : > { %3412 = vperm.xlu2 %4097, %v4182_v55   ;;  %v4192_v13 = vpop.eup %4191  ;;  %v3377_v36 = vadd.f32 %v3263_v17, %v5533_v8  ;;  %v3207_v8 = vpop.f32.mrf.mxu2  ;;  %v3504_v55 = vld [vmem:[%s5745_s24 + $0x30] sm:$0xff]  ;;  %v3509_v17 = vld [vmem:[%s5745_s24 + $0x58] sm:$0xff] }
 0x34f   : > { %3422 = vperm.xlu0 %4098, %v4184_v12   ;;  %v4194_v52 = vpop.eup %4193  ;;  %v3291_v14 = vpop.f32.mrf.mxu1 }
 0x352   : > { %3432 = vperm.xlu1 %4096, %v4186_v62  }
 0x356   : > { %3442 = vperm.xlu2 %4097, %v4188_v50   ;;  %v3209_v27 = vpop.f32.mrf.mxu2  ;;  %v3373_v50 = vadd.f32 %v3207_v8, %v5549_v45  ;;  %v3347_v45 = vpop.f32.mrf.mxu3 }
 0x357   : > { %3452 = vperm.xlu0 %4098, %v4190_v24   ;;  %v3374_v5 = vadd.f32 %v3209_v27, %v5616_v53  ;;  %v3293_v26 = vpop.f32.mrf.mxu1  ;;  %v3383_v8 = vadd.f32 %v3347_v45, %v5530_v16  ;;  %v3512_v16 = vld [vmem:[%s5745_s24 + $0x70] sm:$0xff] }
 0x358   : > { %v3380_v58 = vadd.f32 %v3293_v26, %v5595_v11 }
 0x35a   : > { %3462 = vperm.xlu1 %4096, %v4192_v13  }
 0x35e   : > { %3457 = vperm.xlu2 %4097, %v4194_v52   ;;  %v3319_v12 = vpop.f32.mrf.mxu2 }
 0x35f   : > { %v3381_v13 = vadd.f32 %v3319_v12, %v5546_v2 }
 0x38f   : > { %v3428_v48 = vpop.permute.xlu2 %3427 }
 0x390   : > { %v3473_v43 = vmul.f32 %v3428_v48, %v3377_v36 }
 0x392   : > { %v3490_v56 = vmul.f32 %v5743_v28, %v3473_v43 }
 0x394   : > { %v3522_v9 = vadd.f32 %v3506_v22, %v3490_v56  ;;  %v3510_v22 = vld [vmem:[%s5745_s24 + $0x60] sm:$0xff] }
 0x396   : > { %3538 = vst.msk [vmem:[%s5749_s21 + $0x40] sm:$0xff] %vm1222_vm4, %v3522_v9 }
 0x3a0   : > { %v3393_v0 = vpop.permute.xlu2 %3392 }
 0x3a1   : > { %v3466_v18 = vmul.f32 %v3393_v0, %v3370_v21  ;;  %v3379_v0 = vadd.f32 %v3291_v14, %v5523_v44 }
 0x3a3   : > { %v3483_v30 = vmul.f32 %v5743_v28, %v3466_v18 }
 0x3a4   : > { %v3388_v54 = vpop.permute.xlu1 %3387 }
 0x3a5   : > { %v3465_v37 = vmul.f32 %v3388_v54, %v3369_v20  ;;  %v3515_v39 = vadd.f32 %v3499_v51, %v3483_v30  ;;  %v3372_v20 = vadd.f32 %v5753_v49, %v5599_v35 }
 0x3a7   : > { %v3482_v32 = vmul.f32 %v5743_v28, %v3465_v37  ;;  %3531 = vst.msk [vmem:[%s5749_s21 + $0x8] sm:$0xff] %vm1222_vm4, %v3515_v39  ;;  %v3508_v37 = vld [vmem:[%s5745_s24 + $0x50] sm:$0xff]  ;;  %v3265_v39 = vpop.f32.mrf.mxu0 }
 0x3a8   : > { %v3413_v6 = vpop.permute.xlu2 %3412  ;;  %v3398_v25 = vpop.permute.xlu0 %3397 }
 0x3a9   : > { %v3514_v19 = vadd.f32 %v3498_v4, %v3482_v32  ;;  %v3470_v63 = vmul.f32 %v3413_v6, %v3374_v5  ;;  %v3467_v33 = vmul.f32 %v3398_v25, %v3371_v60  ;;  %v3501_v4 = vld [vmem:[%s5745_s24 + $0x18] sm:$0xff]  ;;  %v3378_v60 = vadd.f32 %v3265_v39, %v5602_v23 }
 0x3ab   : > { %3530 = vst.msk [vmem:[%s5749_s21] sm:$0xff] %vm1222_vm4, %v3514_v19  ;;  %v3487_v53 = vmul.f32 %v5743_v28, %v3470_v63  ;;  %v3484_v3 = vmul.f32 %v5743_v28, %v3467_v33  ;;  %v3376_v19 = vadd.f32 %v3237_v57, %v5605_v41  ;;  %v3505_v63 = vld [vmem:[%s5745_s24 + $0x38] sm:$0xff]  ;;  %v3507_v41 = vld [vmem:[%s5745_s24 + $0x48] sm:$0xff] }
 0x3ac   : > { %v3418_v40 = vpop.permute.xlu1 %3417 }
 0x3ad   : > { %v3471_v34 = vmul.f32 %v3418_v40, %v3375_v31  ;;  %v3519_v29 = vadd.f32 %v3503_v15, %v3487_v53  ;;  %v3516_v62 = vadd.f32 %v3500_v7, %v3484_v3  ;;  %v3321_v40 = vpop.f32.mrf.mxu2  ;;  %v3349_v53 = vpop.f32.mrf.mxu3 }
 0x3ae   : > { %v3382_v57 = vadd.f32 %v3321_v40, %v5619_v42  ;;  %v3384_v26 = vadd.f32 %v3349_v53, %v5613_v10 }
 0x3af   : > { %v3488_v61 = vmul.f32 %v5743_v28, %v3471_v34  ;;  %3535 = vst.msk [vmem:[%s5749_s21 + $0x28] sm:$0xff] %vm1222_vm4, %v3519_v29 }
 0x3b0   : > { %3532 = vst.msk [vmem:[%s5749_s21 + $0x10] sm:$0xff] %vm1222_vm4, %v3516_v62  ;;  %v3443_v24 = vpop.permute.xlu2 %3442  ;;  %v3408_v52 = vpop.permute.xlu0 %3407  ;;  %v3513_v62 = vld [vmem:[%s5745_s24 + $0x78] sm:$0xff] }
 0x3b1   : > { %v3520_v46 = vadd.f32 %v3504_v55, %v3488_v61  ;;  %v3476_v47 = vmul.f32 %v3443_v24, %v3380_v58  ;;  %v3469_v38 = vmul.f32 %v3408_v52, %v3373_v50  ;;  %v3511_v61 = vld [vmem:[%s5745_s24 + $0x68] sm:$0xff] }
 0x3b3   : > { %3536 = vst.msk [vmem:[%s5749_s21 + $0x30] sm:$0xff] %vm1222_vm4, %v3520_v46  ;;  %v3493_v36 = vmul.f32 %v5743_v28, %v3476_v47  ;;  %v3486_v43 = vmul.f32 %v5743_v28, %v3469_v38 }
 0x3b4   : > { %v3448_v11 = vpop.permute.xlu1 %3447 }
 0x3b5   : > { %v3477_v48 = vmul.f32 %v3448_v11, %v3381_v13  ;;  %v3525_v2 = vadd.f32 %v3509_v17, %v3493_v36  ;;  %v3518_v9 = vadd.f32 %v3502_v1, %v3486_v43 }
 0x3b7   : > { %v3494_v56 = vmul.f32 %v5743_v28, %v3477_v48  ;;  %3541 = vst.msk [vmem:[%s5749_s21 + $0x58] sm:$0xff] %vm1222_vm4, %v3525_v2 }
 0x3b8   : > { %3534 = vst.msk [vmem:[%s5749_s21 + $0x20] sm:$0xff] %vm1222_vm4, %v3518_v9  ;;  %v3458_v59 = vpop.permute.xlu2 %3457 }
 0x3b9   : > { %v3526_v21 = vadd.f32 %v3510_v22, %v3494_v56  ;;  %v3438_v18 = vpop.permute.xlu0 %3437  ;;  %v3479_v51 = vmul.f32 %v3458_v59, %v3383_v8 }
 0x3ba   : > { %v3475_v54 = vmul.f32 %v3438_v18, %v3379_v0 }
 0x3bb   : > { %3542 = vst.msk [vmem:[%s5749_s21 + $0x60] sm:$0xff] %vm1222_vm4, %v3526_v21  ;;  %v3496_v44 = vmul.f32 %v5743_v28, %v3479_v51 }
 0x3bc   : > { %v3403_v30 = vpop.permute.xlu1 %3402  ;;  %v3492_v27 = vmul.f32 %v5743_v28, %v3475_v54 }
 0x3bd   : > { %v3468_v14 = vmul.f32 %v3403_v30, %v3372_v20  ;;  %v3528_v35 = vadd.f32 %v3512_v16, %v3496_v44 }
 0x3be   : > { %v3524_v32 = vadd.f32 %v3508_v37, %v3492_v27 }
 0x3bf   : > { %v3485_v49 = vmul.f32 %v5743_v28, %v3468_v14  ;;  %3544 = vst.msk [vmem:[%s5749_s21 + $0x70] sm:$0xff] %vm1222_vm4, %v3528_v35 }
 0x3c0   : > { %3540 = vst.msk [vmem:[%s5749_s21 + $0x50] sm:$0xff] %vm1222_vm4, %v3524_v32 }
 0x3c1   : > { %v3517_v5 = vadd.f32 %v3501_v4, %v3485_v49  ;;  %v3423_v6 = vpop.permute.xlu0 %3422 }
 0x3c2   : > { %v3472_v31 = vmul.f32 %v3423_v6, %v3376_v19 }
 0x3c3   : > { %3533 = vst.msk [vmem:[%s5749_s21 + $0x18] sm:$0xff] %vm1222_vm4, %v3517_v5 }
 0x3c4   : > { %v3433_v25 = vpop.permute.xlu1 %3432  ;;  %v3489_v15 = vmul.f32 %v5743_v28, %v3472_v31 }
 0x3c5   : > { %v3474_v33 = vmul.f32 %v3433_v25, %v3378_v60 }
 0x3c6   : > { %v3521_v23 = vadd.f32 %v3505_v63, %v3489_v15 }
 0x3c7   : > { %v3491_v7 = vmul.f32 %v5743_v28, %v3474_v33 }
 0x3c8   : > { %3537 = vst.msk [vmem:[%s5749_s21 + $0x38] sm:$0xff] %vm1222_vm4, %v3521_v23 }
 0x3c9   : > { %v3523_v34 = vadd.f32 %v3507_v41, %v3491_v7  ;;  %v3453_v3 = vpop.permute.xlu0 %3452 }
 0x3ca   : > { %v3478_v55 = vmul.f32 %v3453_v3, %v3382_v57 }
 0x3cb   : > { %3539 = vst.msk [vmem:[%s5749_s21 + $0x48] sm:$0xff] %vm1222_vm4, %v3523_v34 }
 0x3cc   : > { %v3463_v29 = vpop.permute.xlu1 %3462  ;;  %v3495_v42 = vmul.f32 %v5743_v28, %v3478_v55 }
 0x3cd   : > { %v3480_v12 = vmul.f32 %v3463_v29, %v3384_v26 }
 0x3ce   : > { %v3527_v58 = vadd.f32 %v3511_v61, %v3495_v42 }
 0x3cf   : > { %v3497_v10 = vmul.f32 %v5743_v28, %v3480_v12 }
 0x3d0   : > { %3543 = vst.msk [vmem:[%s5749_s21 + $0x68] sm:$0xff] %vm1222_vm4, %v3527_v58 }
 0x3d1   : > { %v3529_v46 = vadd.f32 %v3513_v62, %v3497_v10 }
 0x3d3   : > { %3545 = vst.msk [vmem:[%s5749_s21 + $0x78] sm:$0xff] %vm1222_vm4, %v3529_v46 }
 0x3d4   : > { %4312 = shalt.err (!%p4309_p0)
}
 0x3d5   : > { %s4398_s14 = smov 128   ;;  %s4399_s5 = smov 8  }
 0x3d6   : > { %4003 = dma.vmem_to_hbm [thread:$0]  (%p4512_p9), %s3563_s13, 2048, %s3565_s19, %s3547_s25, %s4398_s14, %s4398_s14, %s4399_s5  }
 0x3d7 PF: > { %s5968_s18 = sld [smem:[#allocation13_spill]]  ;;  %p4020_p1 = scmp.ge.s32.totalorder %s4387_s6, 2 }
 0x3d9   : > { %p4016_p2 = pnand %p4020_p1, %p4518_p12 }
 0x3db   : > { %p4017_p3 = pneg %p4016_p2 }
 0x3dd   : > { %s3579_s21 = sand.u32 1, %s5968_s18  }
 0x3de   : > { %s3580_s10 = scalar_lea.sflag [#allocation5], %s3579_s21 }
 0x3df   : > { %4354 = dma.done.wait (%p4017_p3), %s3580_s10, 2048  }
 0x3e0   : > { %4356 = vsyncadd (%p4017_p3), %s3580_s10, 4294965248  ;;  %s27_s6 = sadd.s32 1, %s4387_s6   ;;  %s5970_s28 = sld [smem:[#allocation14_spill]] }
 0x3e1   : > { %p24_p4 = scmp.ge.s32.totalorder %s27_s6, 6   ;;  %s5971_s12 = sld [smem:[#allocation19_spill]] }
 0x3e2   : > { %s5972_s17 = sld [smem:[#allocation15_spill]]  ;;  %s5974_s26 = smov %s4363_s27 }
 0x3e3   : > { %s5973_s13 = sld [smem:[#allocation16_spill]]  ;;  %s5977_s29 = smov %s4379_s8 }
 0x3e4   : > { %s5978_s30 = smov %s4383_s9 }
 0x3e5   :  { %26 = sbr.rel (!%p24_p4) target bundleno = 15 (0xf), region = 126 }
 0x3e6   : > { %s5975_s27 = smov %s5970_s28 }
 0x3e7   : > { %s5976_s28 = smov %s5971_s12 }
 0x3e8   : > { %s5979_s8 = smov %s5972_s17 }
 0x3e9   : > { %s5980_s9 = smov %s5973_s13 }
 0x3ea   :  { %3586 = vsyncpa [#allocation4], 1 }
 0x3eb   :  { %3588 = vsyncpa [#allocation4 + $0x1], 1 }
 0x3ec   :  { %3589 = vsyncpa [#allocation7], 1 }
 0x3ed   :  { %3591 = vsyncpa [#allocation7 + $0x1], 1 }
 0x3ee   :  { %3592 = vsyncpa [#allocation5], 1 }
 0x3ef   :  { %3594 = vsyncpa [#allocation5 + $0x1], 1 }

</bundles_post_ra>
